<compile_context>
chip_gen: v7x
topology: tpu7x:2x2x1
jax: 0.10.0
libtpu: 0.0.40
codegen_flags: <defaults>
</compile_context>

<pallas_src>
import jax
import jax.numpy as jnp
import numpy as np
from jax.experimental import pallas as pl
from jax.experimental.pallas import tpu as pltpu

# ---- small, module-consistent sizes ----
SEQ_LEN     = 8    # the module's global `seq_len`
INPUT_SIZE  = 16   # LSTM input feature dim
HIDDEN_SIZE = 32
ENCODE_SIZE = 5
N_FEAT      = 5    # module global `n_feat` (== encode_size so the .view() works)
BATCH       = 4


def lstm_ae_kernel(x_ref,         # (T*B, Din)    bf16, time-major rows t*B + b
                   ew_ih_ref,     # (Din, 4H)     bf16, encoder W_ih^T (i/f/o cols *0.5)
                   ew_hh_ref,     # (H, 4H)       bf16, encoder W_hh^T (i/f/o cols *0.5)
                   eb_ref,        # (1, 4H)       f32,  encoder b_ih+b_hh (i/f/o *0.5)
                   comb_ref,      # (T*H, NF)     bf16, fused encoder_fc @ output_fc
                   btot_ref,      # (1, NF)       f32,  fused output bias
                   wg_ref,        # (NF, T*4Din)  bf16, fused dec_input_fc@dec_fc@dec_W_ih
                   bg_ref,        # (1, T*4Din)   f32,  fused decoder gate bias
                   dw_hh_ref,     # (Din, 4Din)   bf16, decoder W_hh^T (i/f/o cols *0.5)
                   enc_out_ref,   # (B, NF)       f32 out
                   dec_out_ref,   # (B, T*Din)    f32 out (lane-dense)
                   hbuf_ref):     # (B, T*H)      f32 scratch for the fused readout
    TB, Din = x_ref.shape
    H = ew_hh_ref.shape[0]
    B = enc_out_ref.shape[0]
    T = TB // B
    D4 = dw_hh_ref.shape[1]          # 4 * Din
    Dh = D4 // 4

    ew_hh = ew_hh_ref[...]
    dw_hh = dw_hh_ref[...]

    def lstm_cell(pre, h, c, w_hh, hd):
        # `pre` already holds x_t @ W_ih + (b_ih + b_hh), i/f/o columns pre-scaled by 0.5.
        g = pre + jnp.dot(h.astype(jnp.bfloat16), w_hh,
                          preferred_element_type=jnp.float32)      # (B, 4*hd)
        t = jnp.tanh(g)              # single EUP pass over the whole gate block
        a = 0.5 * t + 0.5            # sigmoid(x) = 0.5*(1 + tanh(x/2));  VPU fma
        i_g = a[:, 0 * hd:1 * hd]
        f_g = a[:, 1 * hd:2 * hd]
        o_g = a[:, 3 * hd:4 * hd]
        g_g = t[:, 2 * hd:3 * hd]
        c_n = f_g * c + i_g * g_g
        h_n = o_g * jnp.tanh(c_n)
        return h_n, c_n

    # -- encoder: ONE batched input projection for all T timesteps (off the h-chain) --
    xg_all = jnp.dot(x_ref[...], ew_ih_ref[...],
                     preferred_element_type=jnp.float32) + eb_ref[...]    # (T*B, 4H)
    xg = [xg_all[t * B:(t + 1) * B, :] for t in range(T)]

    h = jnp.zeros((B, H), jnp.float32)
    c = jnp.zeros((B, H), jnp.float32)
    for t in range(T):                                   # fully unrolled (T static)
        h, c = lstm_cell(xg[t], h, c, ew_hh, H)
        hbuf_ref[:, t * H:(t + 1) * H] = h               # off-chain store of h_t

    # fused encoder_fc -> flatten -> output_fc: one (B, T*H) @ (T*H, NF) matmul
    enc_out = (jnp.dot(hbuf_ref[...].astype(jnp.bfloat16), comb_ref[...],
                       preferred_element_type=jnp.float32) + btot_ref[...])   # (B, NF)
    enc_out_ref[...] = enc_out

    # -- decoder: ONE batched pre-gate projection for all T timesteps --
    pre_all = (jnp.dot(enc_out.astype(jnp.bfloat16), wg_ref[...],
                       preferred_element_type=jnp.float32) + bg_ref[...])     # (B, T*4Din)
    pre = [pre_all[:, t * D4:(t + 1) * D4] for t in range(T)]

    h = jnp.zeros((B, Dh), jnp.float32)
    c = jnp.zeros((B, Dh), jnp.float32)
    for t in range(T):                                   # fully unrolled (T static)
        h, c = lstm_cell(pre[t], h, c, dw_hh, Dh)
        dec_out_ref[:, t * Dh:(t + 1) * Dh] = h          # lane-dense per-step store


def init_params(key):
    """Deterministic init matching PyTorch parameter shapes (uniform +-1/sqrt(fan))."""
    ks = jax.random.split(key, 16)
    H, D, E, NF, T = HIDDEN_SIZE, INPUT_SIZE, ENCODE_SIZE, N_FEAT, SEQ_LEN

    def u(k, shape, fan):
        b = 1.0 / float(np.sqrt(fan))
        return jax.random.uniform(k, shape, jnp.float32, -b, b)

    return dict(
        enc_w_ih=u(ks[0], (4 * H, D), H), enc_w_hh=u(ks[1], (4 * H, H), H),
        enc_b_ih=u(ks[2], (4 * H,), H),   enc_b_hh=u(ks[3], (4 * H,), H),
        efc_w=u(ks[4], (E, H), H),        efc_b=u(ks[5], (E,), H),
        dec_w_ih=u(ks[6], (4 * D, H), D), dec_w_hh=u(ks[7], (4 * D, D), D),
        dec_b_ih=u(ks[8], (4 * D,), D),   dec_b_hh=u(ks[9], (4 * D,), D),
        dfc_w=u(ks[10], (H, E), E),       dfc_b=u(ks[11], (H,), E),
        ofc_w=u(ks[12], (NF, T * E), T * E), ofc_b=u(ks[13], (NF,), T * E),
        dif_w=u(ks[14], (T * E, NF), NF), dif_b=u(ks[15], (T * E,), NF),
    )


def lstm_autoencoder_forward(params, x):
    B, T, Din = x.shape
    H, E, NF = HIDDEN_SIZE, ENCODE_SIZE, N_FEAT

    # Gate-column pre-scale implementing sigmoid(x) = 0.5*(1 + tanh(x/2)).
    # PyTorch gate order is i, f, g, o -> scale i/f/o by 0.5, leave g untouched.
    def ifo_half(n):
        return jnp.concatenate([jnp.full((n,), 0.5, jnp.float32),
                                jnp.full((n,), 0.5, jnp.float32),
                                jnp.ones((n,), jnp.float32),
                                jnp.full((n,), 0.5, jnp.float32)])

    s_enc = ifo_half(H)        # (4H,)
    s_dec = ifo_half(Din)      # (4*Din,)

    # encoder LSTM (pre-transposed so the kernel computes x @ W); bf16 MXU operands
    ew_ih = (params['enc_w_ih'].T * s_enc[None, :]).astype(jnp.bfloat16)   # (Din, 4H)
    ew_hh = (params['enc_w_hh'].T * s_enc[None, :]).astype(jnp.bfloat16)   # (H, 4H)
    eb = ((params['enc_b_ih'] + params['enc_b_hh']) * s_enc)[None, :]      # (1, 4H) f32

    # fuse encoder_fc -> flatten(1) -> output_fc into one (T*H, NF) weight
    ofw_t = params['ofc_w'].reshape(NF, T, E).transpose(1, 2, 0)           # (T, E, NF)
    comb_w = jnp.einsum('he,ten->thn', params['efc_w'].T, ofw_t)           # (T, H, NF)
    comb_flat = comb_w.reshape(T * H, NF).astype(jnp.bfloat16)             # (T*H, NF)
    btot = (jnp.einsum('e,ten->n', params['efc_b'], ofw_t)
            + params['ofc_b'])[None, :]                                    # (1, NF) f32

    # fuse decoder_input_fc -> view -> decoder_fc -> decoder W_ih into (NF, T*4Din)
    diw_t = params['dif_w'].reshape(T, E, NF).transpose(0, 2, 1)           # (T, NF, E)
    dib_t = params['dif_b'].reshape(T, E)                                  # (T, E)
    dfw_T = params['dfc_w'].T                                              # (E, H)
    dw_ih_T = params['dec_w_ih'].T                                         # (H, 4*Din)
    db = params['dec_b_ih'] + params['dec_b_hh']                           # (4*Din,)
    w_dfc = jnp.einsum('tne,eh->tnh', diw_t, dfw_T)                        # (T, NF, H)
    b_dfc = dib_t @ dfw_T + params['dfc_b']                                # (T, H)
    wg = jnp.einsum('tnh,hk->tnk', w_dfc, dw_ih_T) * s_dec                 # (T, NF, 4Din)
    bg = (b_dfc @ dw_ih_T + db) * s_dec                                    # (T, 4Din)
    wg_flat = wg.transpose(1, 0, 2).reshape(NF, T * 4 * Din).astype(jnp.bfloat16)
    bg_flat = bg.reshape(1, T * 4 * Din)                                   # f32

    dw_hh = (params['dec_w_hh'].T * s_dec[None, :]).astype(jnp.bfloat16)   # (Din, 4Din)

    # time-major batched input rows: row index t*B + b  ->  (T*B, Din)
    x_flat = jnp.transpose(x, (1, 0, 2)).reshape(T * B, Din).astype(jnp.bfloat16)

    args = (x_flat, ew_ih, ew_hh, eb, comb_flat, btot, wg_flat, bg_flat, dw_hh)

    vspec = pl.BlockSpec(memory_space=pltpu.MemorySpace.VMEM)
    enc_out, dec_flat = pl.pallas_call(
        lstm_ae_kernel,
        out_shape=(jax.ShapeDtypeStruct((B, NF), jnp.float32),
                   jax.ShapeDtypeStruct((B, T * Din), jnp.float32)),
        in_specs=[vspec] * len(args),
        out_specs=(vspec, vspec),
        scratch_shapes=[pltpu.VMEM((B, T * H), jnp.float32)],
    )(*args)

    dec_out = dec_flat.reshape(B, T, Din)   # free reshape of the lane-dense output
    # The PyTorch module returns decoder_lstm.squeeze(); at these sizes (all dims > 1)
    # that is a no-op, so we return the un-squeezed tensor (robust for batch==1 too).
    return enc_out, dec_out


def reference_forward(params, x):
    """Pure-JAX f32 reference mirroring the PyTorch forward exactly."""
    B, T, Din = x.shape

    def run_lstm(seq, w_ih, w_hh, b_ih, b_hh, hid):
        h = jnp.zeros((B, hid), jnp.float32)
        c = jnp.zeros((B, hid), jnp.float32)
        outs = []
        for t in range(T):
            g = seq[:, t, :] @ w_ih.T + b_ih + h @ w_hh.T + b_hh
            i = jax.nn.sigmoid(g[:, :hid])
            f = jax.nn.sigmoid(g[:, hid:2 * hid])
            gg = jnp.tanh(g[:, 2 * hid:3 * hid])
            o = jax.nn.sigmoid(g[:, 3 * hid:4 * hid])
            c = f * c + i * gg
            h = o * jnp.tanh(c)
            outs.append(h)
        return jnp.stack(outs, axis=1)

    enc = run_lstm(x, params['enc_w_ih'], params['enc_w_hh'],
                   params['enc_b_ih'], params['enc_b_hh'], HIDDEN_SIZE)
    enc_fc = enc @ params['efc_w'].T + params['efc_b']
    flat = enc_fc.reshape(B, SEQ_LEN * ENCODE_SIZE)
    enc_out = flat @ params['ofc_w'].T + params['ofc_b']
    dec_in = (enc_out @ params['dif_w'].T + params['dif_b']).reshape(B, SEQ_LEN, N_FEAT)
    dec_fc = dec_in @ params['dfc_w'].T + params['dfc_b']
    dec = run_lstm(dec_fc, params['dec_w_ih'], params['dec_w_hh'],
                   params['dec_b_ih'], params['dec_b_hh'], INPUT_SIZE)
    return enc_out, dec


if __name__ == "__main__":
    key = jax.random.PRNGKey(0)
    pkey, xkey = jax.random.split(key)
    params = init_params(pkey)
    x = jax.random.normal(xkey, (BATCH, SEQ_LEN, INPUT_SIZE), jnp.float32)

    enc_out, dec_out = jax.jit(lstm_autoencoder_forward)(params, x)
    jax.block_until_ready((enc_out, dec_out))

    assert enc_out.shape == (BATCH, N_FEAT)
    assert dec_out.shape == (BATCH, SEQ_LEN, INPUT_SIZE)

    ref_enc, ref_dec = reference_forward(params, x)
    # Kernel uses bf16 MXU operands with f32 accumulation (per perf review); the f32
    # reference is compared with a standard mixed-precision tolerance (typical observed
    # error over the 16-step recurrence is ~1e-3).
    np.testing.assert_allclose(np.asarray(enc_out), np.asarray(ref_enc),
                               rtol=2e-2, atol=2e-2)
    np.testing.assert_allclose(np.asarray(dec_out), np.asarray(ref_dec),
                               rtol=2e-2, atol=2e-2)
    print("KERNEL_OK")
</pallas_src>

<mosaic_0001>
module attributes {stable_mosaic.version = 11 : i64} {
  func.func @lstm_ae_kernel(%arg0: memref<32x16xbf16, #tpu.memory_space<vmem>>, %arg1: memref<16x128xbf16, #tpu.memory_space<vmem>>, %arg2: memref<32x128xbf16, #tpu.memory_space<vmem>>, %arg3: memref<1x128xf32, #tpu.memory_space<vmem>>, %arg4: memref<256x5xbf16, #tpu.memory_space<vmem>>, %arg5: memref<1x5xf32, #tpu.memory_space<vmem>>, %arg6: memref<5x512xbf16, #tpu.memory_space<vmem>>, %arg7: memref<1x512xf32, #tpu.memory_space<vmem>>, %arg8: memref<16x64xbf16, #tpu.memory_space<vmem>>, %arg9: memref<4x5xf32, #tpu.memory_space<vmem>>, %arg10: memref<4x128xf32, #tpu.memory_space<vmem>>, %arg11: memref<4x256xf32, #tpu.memory_space<vmem>>) attributes {dimension_semantics = [], scalar_prefetch = 0 : i64, scratch_operands = 1 : i64, tpu.core_type = #tpu.core_type<tc>} {
    %c0 = arith.constant 0 : index
    %c0_0 = arith.constant 0 : index
    %0 = vector.load %arg2[%c0, %c0_0] : memref<32x128xbf16, #tpu.memory_space<vmem>>, vector<32x128xbf16>
    %c0_1 = arith.constant 0 : index
    %c0_2 = arith.constant 0 : index
    %1 = vector.load %arg8[%c0_1, %c0_2] : memref<16x64xbf16, #tpu.memory_space<vmem>>, vector<16x64xbf16>
    %c0_3 = arith.constant 0 : index
    %c0_4 = arith.constant 0 : index
    %2 = vector.load %arg0[%c0_3, %c0_4] : memref<32x16xbf16, #tpu.memory_space<vmem>>, vector<32x16xbf16>
    %c0_5 = arith.constant 0 : index
    %c0_6 = arith.constant 0 : index
    %3 = vector.load %arg1[%c0_5, %c0_6] : memref<16x128xbf16, #tpu.memory_space<vmem>>, vector<16x128xbf16>
    %cst = arith.constant dense<0.000000e+00> : vector<32x128xf32>
    %4 = tpu.matmul %2, %3, %cst {dimension_numbers = #tpu.dot_dimension_numbers<[1], [0], [0], [1], [0, 0, 1, 1], [], []>} : vector<32x16xbf16>, vector<16x128xbf16>, vector<32x128xf32> -> vector<32x128xf32>
    %c0_7 = arith.constant 0 : index
    %c0_8 = arith.constant 0 : index
    %5 = vector.load %arg3[%c0_7, %c0_8] : memref<1x128xf32, #tpu.memory_space<vmem>>, vector<1x128xf32>
    %6 = vector.broadcast %5 : vector<1x128xf32> to vector<32x128xf32>
    %7 = arith.addf %4, %6 : vector<32x128xf32>
    %8 = vector.extract_strided_slice %7 {offsets = [0, 0], sizes = [4, 128], strides = [1, 1]} : vector<32x128xf32> to vector<4x128xf32>
    %9 = vector.extract_strided_slice %7 {offsets = [4, 0], sizes = [4, 128], strides = [1, 1]} : vector<32x128xf32> to vector<4x128xf32>
    %10 = vector.extract_strided_slice %7 {offsets = [8, 0], sizes = [4, 128], strides = [1, 1]} : vector<32x128xf32> to vector<4x128xf32>
    %11 = vector.extract_strided_slice %7 {offsets = [12, 0], sizes = [4, 128], strides = [1, 1]} : vector<32x128xf32> to vector<4x128xf32>
    %12 = vector.extract_strided_slice %7 {offsets = [16, 0], sizes = [4, 128], strides = [1, 1]} : vector<32x128xf32> to vector<4x128xf32>
    %13 = vector.extract_strided_slice %7 {offsets = [20, 0], sizes = [4, 128], strides = [1, 1]} : vector<32x128xf32> to vector<4x128xf32>
    %14 = vector.extract_strided_slice %7 {offsets = [24, 0], sizes = [4, 128], strides = [1, 1]} : vector<32x128xf32> to vector<4x128xf32>
    %15 = vector.extract_strided_slice %7 {offsets = [28, 0], sizes = [4, 128], strides = [1, 1]} : vector<32x128xf32> to vector<4x128xf32>
    %cst_9 = arith.constant 0.000000e+00 : f32
    %16 = vector.broadcast %cst_9 : f32 to vector<4x32xf32>
    %cst_10 = arith.constant 0.000000e+00 : f32
    %17 = vector.broadcast %cst_10 : f32 to vector<4x32xf32>
    %18 = arith.truncf %16 : vector<4x32xf32> to vector<4x32xbf16>
    %cst_11 = arith.constant dense<0.000000e+00> : vector<4x128xf32>
    %19 = tpu.matmul %18, %0, %cst_11 {dimension_numbers = #tpu.dot_dimension_numbers<[1], [0], [0], [1], [0, 0, 1, 1], [], []>} : vector<4x32xbf16>, vector<32x128xbf16>, vector<4x128xf32> -> vector<4x128xf32>
    %20 = arith.addf %8, %19 : vector<4x128xf32>
    %21 = math.tanh %20 : vector<4x128xf32>
    %cst_12 = arith.constant 5.000000e-01 : f32
    %22 = vector.broadcast %cst_12 : f32 to vector<4x128xf32>
    %23 = arith.mulf %22, %21 : vector<4x128xf32>
    %cst_13 = arith.constant 5.000000e-01 : f32
    %24 = vector.broadcast %cst_13 : f32 to vector<4x128xf32>
    %25 = arith.addf %23, %24 : vector<4x128xf32>
    %26 = vector.extract_strided_slice %25 {offsets = [0, 0], sizes = [4, 32], strides = [1, 1]} : vector<4x128xf32> to vector<4x32xf32>
    %27 = vector.extract_strided_slice %25 {offsets = [0, 32], sizes = [4, 32], strides = [1, 1]} : vector<4x128xf32> to vector<4x32xf32>
    %28 = vector.extract_strided_slice %25 {offsets = [0, 96], sizes = [4, 32], strides = [1, 1]} : vector<4x128xf32> to vector<4x32xf32>
    %29 = vector.extract_strided_slice %21 {offsets = [0, 64], sizes = [4, 32], strides = [1, 1]} : vector<4x128xf32> to vector<4x32xf32>
    %30 = arith.mulf %27, %17 : vector<4x32xf32>
    %31 = arith.mulf %26, %29 : vector<4x32xf32>
    %32 = arith.addf %30, %31 : vector<4x32xf32>
    %33 = math.tanh %32 : vector<4x32xf32>
    %34 = arith.mulf %28, %33 : vector<4x32xf32>
    %c0_14 = arith.constant 0 : index
    %c0_15 = arith.constant 0 : index
    %35 = vector.load %arg11[%c0_14, %c0_15] : memref<4x256xf32, #tpu.memory_space<vmem>>, vector<4x32xf32>
    tpu.vector_store %arg11[%c0_14, %c0_15], %34 {strides = array<i32>} : memref<4x256xf32, #tpu.memory_space<vmem>>, vector<4x32xf32>,
    %36 = arith.truncf %34 : vector<4x32xf32> to vector<4x32xbf16>
    %cst_16 = arith.constant dense<0.000000e+00> : vector<4x128xf32>
    %37 = tpu.matmul %36, %0, %cst_16 {dimension_numbers = #tpu.dot_dimension_numbers<[1], [0], [0], [1], [0, 0, 1, 1], [], []>} : vector<4x32xbf16>, vector<32x128xbf16>, vector<4x128xf32> -> vector<4x128xf32>
    %38 = arith.addf %9, %37 : vector<4x128xf32>
    %39 = math.tanh %38 : vector<4x128xf32>
    %cst_17 = arith.constant 5.000000e-01 : f32
    %40 = vector.broadcast %cst_17 : f32 to vector<4x128xf32>
    %41 = arith.mulf %40, %39 : vector<4x128xf32>
    %cst_18 = arith.constant 5.000000e-01 : f32
    %42 = vector.broadcast %cst_18 : f32 to vector<4x128xf32>
    %43 = arith.addf %41, %42 : vector<4x128xf32>
    %44 = vector.extract_strided_slice %43 {offsets = [0, 0], sizes = [4, 32], strides = [1, 1]} : vector<4x128xf32> to vector<4x32xf32>
    %45 = vector.extract_strided_slice %43 {offsets = [0, 32], sizes = [4, 32], strides = [1, 1]} : vector<4x128xf32> to vector<4x32xf32>
    %46 = vector.extract_strided_slice %43 {offsets = [0, 96], sizes = [4, 32], strides = [1, 1]} : vector<4x128xf32> to vector<4x32xf32>
    %47 = vector.extract_strided_slice %39 {offsets = [0, 64], sizes = [4, 32], strides = [1, 1]} : vector<4x128xf32> to vector<4x32xf32>
    %48 = arith.mulf %45, %32 : vector<4x32xf32>
    %49 = arith.mulf %44, %47 : vector<4x32xf32>
    %50 = arith.addf %48, %49 : vector<4x32xf32>
    %51 = math.tanh %50 : vector<4x32xf32>
    %52 = arith.mulf %46, %51 : vector<4x32xf32>
    %c0_19 = arith.constant 0 : index
    %c32 = arith.constant 32 : index
    %53 = vector.load %arg11[%c0_19, %c32] : memref<4x256xf32, #tpu.memory_space<vmem>>, vector<4x32xf32>
    tpu.vector_store %arg11[%c0_19, %c32], %52 {strides = array<i32>} : memref<4x256xf32, #tpu.memory_space<vmem>>, vector<4x32xf32>,
    %54 = arith.truncf %52 : vector<4x32xf32> to vector<4x32xbf16>
    %cst_20 = arith.constant dense<0.000000e+00> : vector<4x128xf32>
    %55 = tpu.matmul %54, %0, %cst_20 {dimension_numbers = #tpu.dot_dimension_numbers<[1], [0], [0], [1], [0, 0, 1, 1], [], []>} : vector<4x32xbf16>, vector<32x128xbf16>, vector<4x128xf32> -> vector<4x128xf32>
    %56 = arith.addf %10, %55 : vector<4x128xf32>
    %57 = math.tanh %56 : vector<4x128xf32>
    %cst_21 = arith.constant 5.000000e-01 : f32
    %58 = vector.broadcast %cst_21 : f32 to vector<4x128xf32>
    %59 = arith.mulf %58, %57 : vector<4x128xf32>
    %cst_22 = arith.constant 5.000000e-01 : f32
    %60 = vector.broadcast %cst_22 : f32 to vector<4x128xf32>
    %61 = arith.addf %59, %60 : vector<4x128xf32>
    %62 = vector.extract_strided_slice %61 {offsets = [0, 0], sizes = [4, 32], strides = [1, 1]} : vector<4x128xf32> to vector<4x32xf32>
    %63 = vector.extract_strided_slice %61 {offsets = [0, 32], sizes = [4, 32], strides = [1, 1]} : vector<4x128xf32> to vector<4x32xf32>
    %64 = vector.extract_strided_slice %61 {offsets = [0, 96], sizes = [4, 32], strides = [1, 1]} : vector<4x128xf32> to vector<4x32xf32>
    %65 = vector.extract_strided_slice %57 {offsets = [0, 64], sizes = [4, 32], strides = [1, 1]} : vector<4x128xf32> to vector<4x32xf32>
    %66 = arith.mulf %63, %50 : vector<4x32xf32>
    %67 = arith.mulf %62, %65 : vector<4x32xf32>
    %68 = arith.addf %66, %67 : vector<4x32xf32>
    %69 = math.tanh %68 : vector<4x32xf32>
    %70 = arith.mulf %64, %69 : vector<4x32xf32>
    %c0_23 = arith.constant 0 : index
    %c64 = arith.constant 64 : index
    %71 = vector.load %arg11[%c0_23, %c64] : memref<4x256xf32, #tpu.memory_space<vmem>>, vector<4x32xf32>
    tpu.vector_store %arg11[%c0_23, %c64], %70 {strides = array<i32>} : memref<4x256xf32, #tpu.memory_space<vmem>>, vector<4x32xf32>,
    %72 = arith.truncf %70 : vector<4x32xf32> to vector<4x32xbf16>
    %cst_24 = arith.constant dense<0.000000e+00> : vector<4x128xf32>
    %73 = tpu.matmul %72, %0, %cst_24 {dimension_numbers = #tpu.dot_dimension_numbers<[1], [0], [0], [1], [0, 0, 1, 1], [], []>} : vector<4x32xbf16>, vector<32x128xbf16>, vector<4x128xf32> -> vector<4x128xf32>
    %74 = arith.addf %11, %73 : vector<4x128xf32>
    %75 = math.tanh %74 : vector<4x128xf32>
    %cst_25 = arith.constant 5.000000e-01 : f32
    %76 = vector.broadcast %cst_25 : f32 to vector<4x128xf32>
    %77 = arith.mulf %76, %75 : vector<4x128xf32>
    %cst_26 = arith.constant 5.000000e-01 : f32
    %78 = vector.broadcast %cst_26 : f32 to vector<4x128xf32>
    %79 = arith.addf %77, %78 : vector<4x128xf32>
    %80 = vector.extract_strided_slice %79 {offsets = [0, 0], sizes = [4, 32], strides = [1, 1]} : vector<4x128xf32> to vector<4x32xf32>
    %81 = vector.extract_strided_slice %79 {offsets = [0, 32], sizes = [4, 32], strides = [1, 1]} : vector<4x128xf32> to vector<4x32xf32>
    %82 = vector.extract_strided_slice %79 {offsets = [0, 96], sizes = [4, 32], strides = [1, 1]} : vector<4x128xf32> to vector<4x32xf32>
    %83 = vector.extract_strided_slice %75 {offsets = [0, 64], sizes = [4, 32], strides = [1, 1]} : vector<4x128xf32> to vector<4x32xf32>
    %84 = arith.mulf %81, %68 : vector<4x32xf32>
    %85 = arith.mulf %80, %83 : vector<4x32xf32>
    %86 = arith.addf %84, %85 : vector<4x32xf32>
    %87 = math.tanh %86 : vector<4x32xf32>
    %88 = arith.mulf %82, %87 : vector<4x32xf32>
    %c0_27 = arith.constant 0 : index
    %c96 = arith.constant 96 : index
    %89 = vector.load %arg11[%c0_27, %c96] : memref<4x256xf32, #tpu.memory_space<vmem>>, vector<4x32xf32>
    tpu.vector_store %arg11[%c0_27, %c96], %88 {strides = array<i32>} : memref<4x256xf32, #tpu.memory_space<vmem>>, vector<4x32xf32>,
    %90 = arith.truncf %88 : vector<4x32xf32> to vector<4x32xbf16>
    %cst_28 = arith.constant dense<0.000000e+00> : vector<4x128xf32>
    %91 = tpu.matmul %90, %0, %cst_28 {dimension_numbers = #tpu.dot_dimension_numbers<[1], [0], [0], [1], [0, 0, 1, 1], [], []>} : vector<4x32xbf16>, vector<32x128xbf16>, vector<4x128xf32> -> vector<4x128xf32>
    %92 = arith.addf %12, %91 : vector<4x128xf32>
    %93 = math.tanh %92 : vector<4x128xf32>
    %cst_29 = arith.constant 5.000000e-01 : f32
    %94 = vector.broadcast %cst_29 : f32 to vector<4x128xf32>
    %95 = arith.mulf %94, %93 : vector<4x128xf32>
    %cst_30 = arith.constant 5.000000e-01 : f32
    %96 = vector.broadcast %cst_30 : f32 to vector<4x128xf32>
    %97 = arith.addf %95, %96 : vector<4x128xf32>
    %98 = vector.extract_strided_slice %97 {offsets = [0, 0], sizes = [4, 32], strides = [1, 1]} : vector<4x128xf32> to vector<4x32xf32>
    %99 = vector.extract_strided_slice %97 {offsets = [0, 32], sizes = [4, 32], strides = [1, 1]} : vector<4x128xf32> to vector<4x32xf32>
    %100 = vector.extract_strided_slice %97 {offsets = [0, 96], sizes = [4, 32], strides = [1, 1]} : vector<4x128xf32> to vector<4x32xf32>
    %101 = vector.extract_strided_slice %93 {offsets = [0, 64], sizes = [4, 32], strides = [1, 1]} : vector<4x128xf32> to vector<4x32xf32>
    %102 = arith.mulf %99, %86 : vector<4x32xf32>
    %103 = arith.mulf %98, %101 : vector<4x32xf32>
    %104 = arith.addf %102, %103 : vector<4x32xf32>
    %105 = math.tanh %104 : vector<4x32xf32>
    %106 = arith.mulf %100, %105 : vector<4x32xf32>
    %c0_31 = arith.constant 0 : index
    %c128 = arith.constant 128 : index
    %107 = vector.load %arg11[%c0_31, %c128] : memref<4x256xf32, #tpu.memory_space<vmem>>, vector<4x32xf32>
    tpu.vector_store %arg11[%c0_31, %c128], %106 {strides = array<i32>} : memref<4x256xf32, #tpu.memory_space<vmem>>, vector<4x32xf32>,
    %108 = arith.truncf %106 : vector<4x32xf32> to vector<4x32xbf16>
    %cst_32 = arith.constant dense<0.000000e+00> : vector<4x128xf32>
    %109 = tpu.matmul %108, %0, %cst_32 {dimension_numbers = #tpu.dot_dimension_numbers<[1], [0], [0], [1], [0, 0, 1, 1], [], []>} : vector<4x32xbf16>, vector<32x128xbf16>, vector<4x128xf32> -> vector<4x128xf32>
    %110 = arith.addf %13, %109 : vector<4x128xf32>
    %111 = math.tanh %110 : vector<4x128xf32>
    %cst_33 = arith.constant 5.000000e-01 : f32
    %112 = vector.broadcast %cst_33 : f32 to vector<4x128xf32>
    %113 = arith.mulf %112, %111 : vector<4x128xf32>
    %cst_34 = arith.constant 5.000000e-01 : f32
    %114 = vector.broadcast %cst_34 : f32 to vector<4x128xf32>
    %115 = arith.addf %113, %114 : vector<4x128xf32>
    %116 = vector.extract_strided_slice %115 {offsets = [0, 0], sizes = [4, 32], strides = [1, 1]} : vector<4x128xf32> to vector<4x32xf32>
    %117 = vector.extract_strided_slice %115 {offsets = [0, 32], sizes = [4, 32], strides = [1, 1]} : vector<4x128xf32> to vector<4x32xf32>
    %118 = vector.extract_strided_slice %115 {offsets = [0, 96], sizes = [4, 32], strides = [1, 1]} : vector<4x128xf32> to vector<4x32xf32>
    %119 = vector.extract_strided_slice %111 {offsets = [0, 64], sizes = [4, 32], strides = [1, 1]} : vector<4x128xf32> to vector<4x32xf32>
    %120 = arith.mulf %117, %104 : vector<4x32xf32>
    %121 = arith.mulf %116, %119 : vector<4x32xf32>
    %122 = arith.addf %120, %121 : vector<4x32xf32>
    %123 = math.tanh %122 : vector<4x32xf32>
    %124 = arith.mulf %118, %123 : vector<4x32xf32>
    %c0_35 = arith.constant 0 : index
    %c160 = arith.constant 160 : index
    %125 = vector.load %arg11[%c0_35, %c160] : memref<4x256xf32, #tpu.memory_space<vmem>>, vector<4x32xf32>
    tpu.vector_store %arg11[%c0_35, %c160], %124 {strides = array<i32>} : memref<4x256xf32, #tpu.memory_space<vmem>>, vector<4x32xf32>,
    %126 = arith.truncf %124 : vector<4x32xf32> to vector<4x32xbf16>
    %cst_36 = arith.constant dense<0.000000e+00> : vector<4x128xf32>
    %127 = tpu.matmul %126, %0, %cst_36 {dimension_numbers = #tpu.dot_dimension_numbers<[1], [0], [0], [1], [0, 0, 1, 1], [], []>} : vector<4x32xbf16>, vector<32x128xbf16>, vector<4x128xf32> -> vector<4x128xf32>
    %128 = arith.addf %14, %127 : vector<4x128xf32>
    %129 = math.tanh %128 : vector<4x128xf32>
    %cst_37 = arith.constant 5.000000e-01 : f32
    %130 = vector.broadcast %cst_37 : f32 to vector<4x128xf32>
    %131 = arith.mulf %130, %129 : vector<4x128xf32>
    %cst_38 = arith.constant 5.000000e-01 : f32
    %132 = vector.broadcast %cst_38 : f32 to vector<4x128xf32>
    %133 = arith.addf %131, %132 : vector<4x128xf32>
    %134 = vector.extract_strided_slice %133 {offsets = [0, 0], sizes = [4, 32], strides = [1, 1]} : vector<4x128xf32> to vector<4x32xf32>
    %135 = vector.extract_strided_slice %133 {offsets = [0, 32], sizes = [4, 32], strides = [1, 1]} : vector<4x128xf32> to vector<4x32xf32>
    %136 = vector.extract_strided_slice %133 {offsets = [0, 96], sizes = [4, 32], strides = [1, 1]} : vector<4x128xf32> to vector<4x32xf32>
    %137 = vector.extract_strided_slice %129 {offsets = [0, 64], sizes = [4, 32], strides = [1, 1]} : vector<4x128xf32> to vector<4x32xf32>
    %138 = arith.mulf %135, %122 : vector<4x32xf32>
    %139 = arith.mulf %134, %137 : vector<4x32xf32>
    %140 = arith.addf %138, %139 : vector<4x32xf32>
    %141 = math.tanh %140 : vector<4x32xf32>
    %142 = arith.mulf %136, %141 : vector<4x32xf32>
    %c0_39 = arith.constant 0 : index
    %c192 = arith.constant 192 : index
    %143 = vector.load %arg11[%c0_39, %c192] : memref<4x256xf32, #tpu.memory_space<vmem>>, vector<4x32xf32>
    tpu.vector_store %arg11[%c0_39, %c192], %142 {strides = array<i32>} : memref<4x256xf32, #tpu.memory_space<vmem>>, vector<4x32xf32>,
    %144 = arith.truncf %142 : vector<4x32xf32> to vector<4x32xbf16>
    %cst_40 = arith.constant dense<0.000000e+00> : vector<4x128xf32>
    %145 = tpu.matmul %144, %0, %cst_40 {dimension_numbers = #tpu.dot_dimension_numbers<[1], [0], [0], [1], [0, 0, 1, 1], [], []>} : vector<4x32xbf16>, vector<32x128xbf16>, vector<4x128xf32> -> vector<4x128xf32>
    %146 = arith.addf %15, %145 : vector<4x128xf32>
    %147 = math.tanh %146 : vector<4x128xf32>
    %cst_41 = arith.constant 5.000000e-01 : f32
    %148 = vector.broadcast %cst_41 : f32 to vector<4x128xf32>
    %149 = arith.mulf %148, %147 : vector<4x128xf32>
    %cst_42 = arith.constant 5.000000e-01 : f32
    %150 = vector.broadcast %cst_42 : f32 to vector<4x128xf32>
    %151 = arith.addf %149, %150 : vector<4x128xf32>
    %152 = vector.extract_strided_slice %151 {offsets = [0, 0], sizes = [4, 32], strides = [1, 1]} : vector<4x128xf32> to vector<4x32xf32>
    %153 = vector.extract_strided_slice %151 {offsets = [0, 32], sizes = [4, 32], strides = [1, 1]} : vector<4x128xf32> to vector<4x32xf32>
    %154 = vector.extract_strided_slice %151 {offsets = [0, 96], sizes = [4, 32], strides = [1, 1]} : vector<4x128xf32> to vector<4x32xf32>
    %155 = vector.extract_strided_slice %147 {offsets = [0, 64], sizes = [4, 32], strides = [1, 1]} : vector<4x128xf32> to vector<4x32xf32>
    %156 = arith.mulf %153, %140 : vector<4x32xf32>
    %157 = arith.mulf %152, %155 : vector<4x32xf32>
    %158 = arith.addf %156, %157 : vector<4x32xf32>
    %159 = math.tanh %158 : vector<4x32xf32>
    %160 = arith.mulf %154, %159 : vector<4x32xf32>
    %c0_43 = arith.constant 0 : index
    %c224 = arith.constant 224 : index
    %161 = vector.load %arg11[%c0_43, %c224] : memref<4x256xf32, #tpu.memory_space<vmem>>, vector<4x32xf32>
    tpu.vector_store %arg11[%c0_43, %c224], %160 {strides = array<i32>} : memref<4x256xf32, #tpu.memory_space<vmem>>, vector<4x32xf32>,
    %c0_44 = arith.constant 0 : index
    %c0_45 = arith.constant 0 : index
    %162 = vector.load %arg11[%c0_44, %c0_45] : memref<4x256xf32, #tpu.memory_space<vmem>>, vector<4x256xf32>
    %163 = arith.truncf %162 : vector<4x256xf32> to vector<4x256xbf16>
    %c0_46 = arith.constant 0 : index
    %c0_47 = arith.constant 0 : index
    %164 = vector.load %arg4[%c0_46, %c0_47] : memref<256x5xbf16, #tpu.memory_space<vmem>>, vector<256x5xbf16>
    %cst_48 = arith.constant dense<0.000000e+00> : vector<4x5xf32>
    %165 = tpu.matmul %163, %164, %cst_48 {dimension_numbers = #tpu.dot_dimension_numbers<[1], [0], [0], [1], [0, 0, 1, 1], [], []>} : vector<4x256xbf16>, vector<256x5xbf16>, vector<4x5xf32> -> vector<4x5xf32>
    %c0_49 = arith.constant 0 : index
    %c0_50 = arith.constant 0 : index
    %166 = vector.load %arg5[%c0_49, %c0_50] : memref<1x5xf32, #tpu.memory_space<vmem>>, vector<1x5xf32>
    %167 = vector.broadcast %166 : vector<1x5xf32> to vector<4x5xf32>
    %168 = arith.addf %165, %167 : vector<4x5xf32>
    %c0_51 = arith.constant 0 : index
    %c0_52 = arith.constant 0 : index
    %169 = vector.load %arg9[%c0_51, %c0_52] : memref<4x5xf32, #tpu.memory_space<vmem>>, vector<4x5xf32>
    tpu.vector_store %arg9[%c0_51, %c0_52], %168 {strides = array<i32>} : memref<4x5xf32, #tpu.memory_space<vmem>>, vector<4x5xf32>,
    %170 = arith.truncf %168 : vector<4x5xf32> to vector<4x5xbf16>
    %c0_53 = arith.constant 0 : index
    %c0_54 = arith.constant 0 : index
    %171 = vector.load %arg6[%c0_53, %c0_54] : memref<5x512xbf16, #tpu.memory_space<vmem>>, vector<5x512xbf16>
    %cst_55 = arith.constant dense<0.000000e+00> : vector<4x512xf32>
    %172 = tpu.matmul %170, %171, %cst_55 {dimension_numbers = #tpu.dot_dimension_numbers<[1], [0], [0], [1], [0, 0, 1, 1], [], []>} : vector<4x5xbf16>, vector<5x512xbf16>, vector<4x512xf32> -> vector<4x512xf32>
    %c0_56 = arith.constant 0 : index
    %c0_57 = arith.constant 0 : index
    %173 = vector.load %arg7[%c0_56, %c0_57] : memref<1x512xf32, #tpu.memory_space<vmem>>, vector<1x512xf32>
    %174 = vector.broadcast %173 : vector<1x512xf32> to vector<4x512xf32>
    %175 = arith.addf %172, %174 : vector<4x512xf32>
    %176 = vector.extract_strided_slice %175 {offsets = [0, 0], sizes = [4, 64], strides = [1, 1]} : vector<4x512xf32> to vector<4x64xf32>
    %177 = vector.extract_strided_slice %175 {offsets = [0, 64], sizes = [4, 64], strides = [1, 1]} : vector<4x512xf32> to vector<4x64xf32>
    %178 = vector.extract_strided_slice %175 {offsets = [0, 128], sizes = [4, 64], strides = [1, 1]} : vector<4x512xf32> to vector<4x64xf32>
    %179 = vector.extract_strided_slice %175 {offsets = [0, 192], sizes = [4, 64], strides = [1, 1]} : vector<4x512xf32> to vector<4x64xf32>
    %180 = vector.extract_strided_slice %175 {offsets = [0, 256], sizes = [4, 64], strides = [1, 1]} : vector<4x512xf32> to vector<4x64xf32>
    %181 = vector.extract_strided_slice %175 {offsets = [0, 320], sizes = [4, 64], strides = [1, 1]} : vector<4x512xf32> to vector<4x64xf32>
    %182 = vector.extract_strided_slice %175 {offsets = [0, 384], sizes = [4, 64], strides = [1, 1]} : vector<4x512xf32> to vector<4x64xf32>
    %183 = vector.extract_strided_slice %175 {offsets = [0, 448], sizes = [4, 64], strides = [1, 1]} : vector<4x512xf32> to vector<4x64xf32>
    %cst_58 = arith.constant 0.000000e+00 : f32
    %184 = vector.broadcast %cst_58 : f32 to vector<4x16xf32>
    %cst_59 = arith.constant 0.000000e+00 : f32
    %185 = vector.broadcast %cst_59 : f32 to vector<4x16xf32>
    %186 = arith.truncf %184 : vector<4x16xf32> to vector<4x16xbf16>
    %cst_60 = arith.constant dense<0.000000e+00> : vector<4x64xf32>
    %187 = tpu.matmul %186, %1, %cst_60 {dimension_numbers = #tpu.dot_dimension_numbers<[1], [0], [0], [1], [0, 0, 1, 1], [], []>} : vector<4x16xbf16>, vector<16x64xbf16>, vector<4x64xf32> -> vector<4x64xf32>
    %188 = arith.addf %176, %187 : vector<4x64xf32>
    %189 = math.tanh %188 : vector<4x64xf32>
    %cst_61 = arith.constant 5.000000e-01 : f32
    %190 = vector.broadcast %cst_61 : f32 to vector<4x64xf32>
    %191 = arith.mulf %190, %189 : vector<4x64xf32>
    %cst_62 = arith.constant 5.000000e-01 : f32
    %192 = vector.broadcast %cst_62 : f32 to vector<4x64xf32>
    %193 = arith.addf %191, %192 : vector<4x64xf32>
    %194 = vector.extract_strided_slice %193 {offsets = [0, 0], sizes = [4, 16], strides = [1, 1]} : vector<4x64xf32> to vector<4x16xf32>
    %195 = vector.extract_strided_slice %193 {offsets = [0, 16], sizes = [4, 16], strides = [1, 1]} : vector<4x64xf32> to vector<4x16xf32>
    %196 = vector.extract_strided_slice %193 {offsets = [0, 48], sizes = [4, 16], strides = [1, 1]} : vector<4x64xf32> to vector<4x16xf32>
    %197 = vector.extract_strided_slice %189 {offsets = [0, 32], sizes = [4, 16], strides = [1, 1]} : vector<4x64xf32> to vector<4x16xf32>
    %198 = arith.mulf %195, %185 : vector<4x16xf32>
    %199 = arith.mulf %194, %197 : vector<4x16xf32>
    %200 = arith.addf %198, %199 : vector<4x16xf32>
    %201 = math.tanh %200 : vector<4x16xf32>
    %202 = arith.mulf %196, %201 : vector<4x16xf32>
    %c0_63 = arith.constant 0 : index
    %c0_64 = arith.constant 0 : index
    %203 = vector.load %arg10[%c0_63, %c0_64] : memref<4x128xf32, #tpu.memory_space<vmem>>, vector<4x16xf32>
    tpu.vector_store %arg10[%c0_63, %c0_64], %202 {strides = array<i32>} : memref<4x128xf32, #tpu.memory_space<vmem>>, vector<4x16xf32>,
    %204 = arith.truncf %202 : vector<4x16xf32> to vector<4x16xbf16>
    %cst_65 = arith.constant dense<0.000000e+00> : vector<4x64xf32>
    %205 = tpu.matmul %204, %1, %cst_65 {dimension_numbers = #tpu.dot_dimension_numbers<[1], [0], [0], [1], [0, 0, 1, 1], [], []>} : vector<4x16xbf16>, vector<16x64xbf16>, vector<4x64xf32> -> vector<4x64xf32>
    %206 = arith.addf %177, %205 : vector<4x64xf32>
    %207 = math.tanh %206 : vector<4x64xf32>
    %cst_66 = arith.constant 5.000000e-01 : f32
    %208 = vector.broadcast %cst_66 : f32 to vector<4x64xf32>
    %209 = arith.mulf %208, %207 : vector<4x64xf32>
    %cst_67 = arith.constant 5.000000e-01 : f32
    %210 = vector.broadcast %cst_67 : f32 to vector<4x64xf32>
    %211 = arith.addf %209, %210 : vector<4x64xf32>
    %212 = vector.extract_strided_slice %211 {offsets = [0, 0], sizes = [4, 16], strides = [1, 1]} : vector<4x64xf32> to vector<4x16xf32>
    %213 = vector.extract_strided_slice %211 {offsets = [0, 16], sizes = [4, 16], strides = [1, 1]} : vector<4x64xf32> to vector<4x16xf32>
    %214 = vector.extract_strided_slice %211 {offsets = [0, 48], sizes = [4, 16], strides = [1, 1]} : vector<4x64xf32> to vector<4x16xf32>
    %215 = vector.extract_strided_slice %207 {offsets = [0, 32], sizes = [4, 16], strides = [1, 1]} : vector<4x64xf32> to vector<4x16xf32>
    %216 = arith.mulf %213, %200 : vector<4x16xf32>
    %217 = arith.mulf %212, %215 : vector<4x16xf32>
    %218 = arith.addf %216, %217 : vector<4x16xf32>
    %219 = math.tanh %218 : vector<4x16xf32>
    %220 = arith.mulf %214, %219 : vector<4x16xf32>
    %c0_68 = arith.constant 0 : index
    %c16 = arith.constant 16 : index
    %221 = vector.load %arg10[%c0_68, %c16] : memref<4x128xf32, #tpu.memory_space<vmem>>, vector<4x16xf32>
    tpu.vector_store %arg10[%c0_68, %c16], %220 {strides = array<i32>} : memref<4x128xf32, #tpu.memory_space<vmem>>, vector<4x16xf32>,
    %222 = arith.truncf %220 : vector<4x16xf32> to vector<4x16xbf16>
    %cst_69 = arith.constant dense<0.000000e+00> : vector<4x64xf32>
    %223 = tpu.matmul %222, %1, %cst_69 {dimension_numbers = #tpu.dot_dimension_numbers<[1], [0], [0], [1], [0, 0, 1, 1], [], []>} : vector<4x16xbf16>, vector<16x64xbf16>, vector<4x64xf32> -> vector<4x64xf32>
    %224 = arith.addf %178, %223 : vector<4x64xf32>
    %225 = math.tanh %224 : vector<4x64xf32>
    %cst_70 = arith.constant 5.000000e-01 : f32
    %226 = vector.broadcast %cst_70 : f32 to vector<4x64xf32>
    %227 = arith.mulf %226, %225 : vector<4x64xf32>
    %cst_71 = arith.constant 5.000000e-01 : f32
    %228 = vector.broadcast %cst_71 : f32 to vector<4x64xf32>
    %229 = arith.addf %227, %228 : vector<4x64xf32>
    %230 = vector.extract_strided_slice %229 {offsets = [0, 0], sizes = [4, 16], strides = [1, 1]} : vector<4x64xf32> to vector<4x16xf32>
    %231 = vector.extract_strided_slice %229 {offsets = [0, 16], sizes = [4, 16], strides = [1, 1]} : vector<4x64xf32> to vector<4x16xf32>
    %232 = vector.extract_strided_slice %229 {offsets = [0, 48], sizes = [4, 16], strides = [1, 1]} : vector<4x64xf32> to vector<4x16xf32>
    %233 = vector.extract_strided_slice %225 {offsets = [0, 32], sizes = [4, 16], strides = [1, 1]} : vector<4x64xf32> to vector<4x16xf32>
    %234 = arith.mulf %231, %218 : vector<4x16xf32>
    %235 = arith.mulf %230, %233 : vector<4x16xf32>
    %236 = arith.addf %234, %235 : vector<4x16xf32>
    %237 = math.tanh %236 : vector<4x16xf32>
    %238 = arith.mulf %232, %237 : vector<4x16xf32>
    %c0_72 = arith.constant 0 : index
    %c32_73 = arith.constant 32 : index
    %239 = vector.load %arg10[%c0_72, %c32_73] : memref<4x128xf32, #tpu.memory_space<vmem>>, vector<4x16xf32>
    tpu.vector_store %arg10[%c0_72, %c32_73], %238 {strides = array<i32>} : memref<4x128xf32, #tpu.memory_space<vmem>>, vector<4x16xf32>,
    %240 = arith.truncf %238 : vector<4x16xf32> to vector<4x16xbf16>
    %cst_74 = arith.constant dense<0.000000e+00> : vector<4x64xf32>
    %241 = tpu.matmul %240, %1, %cst_74 {dimension_numbers = #tpu.dot_dimension_numbers<[1], [0], [0], [1], [0, 0, 1, 1], [], []>} : vector<4x16xbf16>, vector<16x64xbf16>, vector<4x64xf32> -> vector<4x64xf32>
    %242 = arith.addf %179, %241 : vector<4x64xf32>
    %243 = math.tanh %242 : vector<4x64xf32>
    %cst_75 = arith.constant 5.000000e-01 : f32
    %244 = vector.broadcast %cst_75 : f32 to vector<4x64xf32>
    %245 = arith.mulf %244, %243 : vector<4x64xf32>
    %cst_76 = arith.constant 5.000000e-01 : f32
    %246 = vector.broadcast %cst_76 : f32 to vector<4x64xf32>
    %247 = arith.addf %245, %246 : vector<4x64xf32>
    %248 = vector.extract_strided_slice %247 {offsets = [0, 0], sizes = [4, 16], strides = [1, 1]} : vector<4x64xf32> to vector<4x16xf32>
    %249 = vector.extract_strided_slice %247 {offsets = [0, 16], sizes = [4, 16], strides = [1, 1]} : vector<4x64xf32> to vector<4x16xf32>
    %250 = vector.extract_strided_slice %247 {offsets = [0, 48], sizes = [4, 16], strides = [1, 1]} : vector<4x64xf32> to vector<4x16xf32>
    %251 = vector.extract_strided_slice %243 {offsets = [0, 32], sizes = [4, 16], strides = [1, 1]} : vector<4x64xf32> to vector<4x16xf32>
    %252 = arith.mulf %249, %236 : vector<4x16xf32>
    %253 = arith.mulf %248, %251 : vector<4x16xf32>
    %254 = arith.addf %252, %253 : vector<4x16xf32>
    %255 = math.tanh %254 : vector<4x16xf32>
    %256 = arith.mulf %250, %255 : vector<4x16xf32>
    %c0_77 = arith.constant 0 : index
    %c48 = arith.constant 48 : index
    %257 = vector.load %arg10[%c0_77, %c48] : memref<4x128xf32, #tpu.memory_space<vmem>>, vector<4x16xf32>
    tpu.vector_store %arg10[%c0_77, %c48], %256 {strides = array<i32>} : memref<4x128xf32, #tpu.memory_space<vmem>>, vector<4x16xf32>,
    %258 = arith.truncf %256 : vector<4x16xf32> to vector<4x16xbf16>
    %cst_78 = arith.constant dense<0.000000e+00> : vector<4x64xf32>
    %259 = tpu.matmul %258, %1, %cst_78 {dimension_numbers = #tpu.dot_dimension_numbers<[1], [0], [0], [1], [0, 0, 1, 1], [], []>} : vector<4x16xbf16>, vector<16x64xbf16>, vector<4x64xf32> -> vector<4x64xf32>
    %260 = arith.addf %180, %259 : vector<4x64xf32>
    %261 = math.tanh %260 : vector<4x64xf32>
    %cst_79 = arith.constant 5.000000e-01 : f32
    %262 = vector.broadcast %cst_79 : f32 to vector<4x64xf32>
    %263 = arith.mulf %262, %261 : vector<4x64xf32>
    %cst_80 = arith.constant 5.000000e-01 : f32
    %264 = vector.broadcast %cst_80 : f32 to vector<4x64xf32>
    %265 = arith.addf %263, %264 : vector<4x64xf32>
    %266 = vector.extract_strided_slice %265 {offsets = [0, 0], sizes = [4, 16], strides = [1, 1]} : vector<4x64xf32> to vector<4x16xf32>
    %267 = vector.extract_strided_slice %265 {offsets = [0, 16], sizes = [4, 16], strides = [1, 1]} : vector<4x64xf32> to vector<4x16xf32>
    %268 = vector.extract_strided_slice %265 {offsets = [0, 48], sizes = [4, 16], strides = [1, 1]} : vector<4x64xf32> to vector<4x16xf32>
    %269 = vector.extract_strided_slice %261 {offsets = [0, 32], sizes = [4, 16], strides = [1, 1]} : vector<4x64xf32> to vector<4x16xf32>
    %270 = arith.mulf %267, %254 : vector<4x16xf32>
    %271 = arith.mulf %266, %269 : vector<4x16xf32>
    %272 = arith.addf %270, %271 : vector<4x16xf32>
    %273 = math.tanh %272 : vector<4x16xf32>
    %274 = arith.mulf %268, %273 : vector<4x16xf32>
    %c0_81 = arith.constant 0 : index
    %c64_82 = arith.constant 64 : index
    %275 = vector.load %arg10[%c0_81, %c64_82] : memref<4x128xf32, #tpu.memory_space<vmem>>, vector<4x16xf32>
    tpu.vector_store %arg10[%c0_81, %c64_82], %274 {strides = array<i32>} : memref<4x128xf32, #tpu.memory_space<vmem>>, vector<4x16xf32>,
    %276 = arith.truncf %274 : vector<4x16xf32> to vector<4x16xbf16>
    %cst_83 = arith.constant dense<0.000000e+00> : vector<4x64xf32>
    %277 = tpu.matmul %276, %1, %cst_83 {dimension_numbers = #tpu.dot_dimension_numbers<[1], [0], [0], [1], [0, 0, 1, 1], [], []>} : vector<4x16xbf16>, vector<16x64xbf16>, vector<4x64xf32> -> vector<4x64xf32>
    %278 = arith.addf %181, %277 : vector<4x64xf32>
    %279 = math.tanh %278 : vector<4x64xf32>
    %cst_84 = arith.constant 5.000000e-01 : f32
    %280 = vector.broadcast %cst_84 : f32 to vector<4x64xf32>
    %281 = arith.mulf %280, %279 : vector<4x64xf32>
    %cst_85 = arith.constant 5.000000e-01 : f32
    %282 = vector.broadcast %cst_85 : f32 to vector<4x64xf32>
    %283 = arith.addf %281, %282 : vector<4x64xf32>
    %284 = vector.extract_strided_slice %283 {offsets = [0, 0], sizes = [4, 16], strides = [1, 1]} : vector<4x64xf32> to vector<4x16xf32>
    %285 = vector.extract_strided_slice %283 {offsets = [0, 16], sizes = [4, 16], strides = [1, 1]} : vector<4x64xf32> to vector<4x16xf32>
    %286 = vector.extract_strided_slice %283 {offsets = [0, 48], sizes = [4, 16], strides = [1, 1]} : vector<4x64xf32> to vector<4x16xf32>
    %287 = vector.extract_strided_slice %279 {offsets = [0, 32], sizes = [4, 16], strides = [1, 1]} : vector<4x64xf32> to vector<4x16xf32>
    %288 = arith.mulf %285, %272 : vector<4x16xf32>
    %289 = arith.mulf %284, %287 : vector<4x16xf32>
    %290 = arith.addf %288, %289 : vector<4x16xf32>
    %291 = math.tanh %290 : vector<4x16xf32>
    %292 = arith.mulf %286, %291 : vector<4x16xf32>
    %c0_86 = arith.constant 0 : index
    %c80 = arith.constant 80 : index
    %293 = vector.load %arg10[%c0_86, %c80] : memref<4x128xf32, #tpu.memory_space<vmem>>, vector<4x16xf32>
    tpu.vector_store %arg10[%c0_86, %c80], %292 {strides = array<i32>} : memref<4x128xf32, #tpu.memory_space<vmem>>, vector<4x16xf32>,
    %294 = arith.truncf %292 : vector<4x16xf32> to vector<4x16xbf16>
    %cst_87 = arith.constant dense<0.000000e+00> : vector<4x64xf32>
    %295 = tpu.matmul %294, %1, %cst_87 {dimension_numbers = #tpu.dot_dimension_numbers<[1], [0], [0], [1], [0, 0, 1, 1], [], []>} : vector<4x16xbf16>, vector<16x64xbf16>, vector<4x64xf32> -> vector<4x64xf32>
    %296 = arith.addf %182, %295 : vector<4x64xf32>
    %297 = math.tanh %296 : vector<4x64xf32>
    %cst_88 = arith.constant 5.000000e-01 : f32
    %298 = vector.broadcast %cst_88 : f32 to vector<4x64xf32>
    %299 = arith.mulf %298, %297 : vector<4x64xf32>
    %cst_89 = arith.constant 5.000000e-01 : f32
    %300 = vector.broadcast %cst_89 : f32 to vector<4x64xf32>
    %301 = arith.addf %299, %300 : vector<4x64xf32>
    %302 = vector.extract_strided_slice %301 {offsets = [0, 0], sizes = [4, 16], strides = [1, 1]} : vector<4x64xf32> to vector<4x16xf32>
    %303 = vector.extract_strided_slice %301 {offsets = [0, 16], sizes = [4, 16], strides = [1, 1]} : vector<4x64xf32> to vector<4x16xf32>
    %304 = vector.extract_strided_slice %301 {offsets = [0, 48], sizes = [4, 16], strides = [1, 1]} : vector<4x64xf32> to vector<4x16xf32>
    %305 = vector.extract_strided_slice %297 {offsets = [0, 32], sizes = [4, 16], strides = [1, 1]} : vector<4x64xf32> to vector<4x16xf32>
    %306 = arith.mulf %303, %290 : vector<4x16xf32>
    %307 = arith.mulf %302, %305 : vector<4x16xf32>
    %308 = arith.addf %306, %307 : vector<4x16xf32>
    %309 = math.tanh %308 : vector<4x16xf32>
    %310 = arith.mulf %304, %309 : vector<4x16xf32>
    %c0_90 = arith.constant 0 : index
    %c96_91 = arith.constant 96 : index
    %311 = vector.load %arg10[%c0_90, %c96_91] : memref<4x128xf32, #tpu.memory_space<vmem>>, vector<4x16xf32>
    tpu.vector_store %arg10[%c0_90, %c96_91], %310 {strides = array<i32>} : memref<4x128xf32, #tpu.memory_space<vmem>>, vector<4x16xf32>,
    %312 = arith.truncf %310 : vector<4x16xf32> to vector<4x16xbf16>
    %cst_92 = arith.constant dense<0.000000e+00> : vector<4x64xf32>
    %313 = tpu.matmul %312, %1, %cst_92 {dimension_numbers = #tpu.dot_dimension_numbers<[1], [0], [0], [1], [0, 0, 1, 1], [], []>} : vector<4x16xbf16>, vector<16x64xbf16>, vector<4x64xf32> -> vector<4x64xf32>
    %314 = arith.addf %183, %313 : vector<4x64xf32>
    %315 = math.tanh %314 : vector<4x64xf32>
    %cst_93 = arith.constant 5.000000e-01 : f32
    %316 = vector.broadcast %cst_93 : f32 to vector<4x64xf32>
    %317 = arith.mulf %316, %315 : vector<4x64xf32>
    %cst_94 = arith.constant 5.000000e-01 : f32
    %318 = vector.broadcast %cst_94 : f32 to vector<4x64xf32>
    %319 = arith.addf %317, %318 : vector<4x64xf32>
    %320 = vector.extract_strided_slice %319 {offsets = [0, 0], sizes = [4, 16], strides = [1, 1]} : vector<4x64xf32> to vector<4x16xf32>
    %321 = vector.extract_strided_slice %319 {offsets = [0, 16], sizes = [4, 16], strides = [1, 1]} : vector<4x64xf32> to vector<4x16xf32>
    %322 = vector.extract_strided_slice %319 {offsets = [0, 48], sizes = [4, 16], strides = [1, 1]} : vector<4x64xf32> to vector<4x16xf32>
    %323 = vector.extract_strided_slice %315 {offsets = [0, 32], sizes = [4, 16], strides = [1, 1]} : vector<4x64xf32> to vector<4x16xf32>
    %324 = arith.mulf %321, %308 : vector<4x16xf32>
    %325 = arith.mulf %320, %323 : vector<4x16xf32>
    %326 = arith.addf %324, %325 : vector<4x16xf32>
    %327 = math.tanh %326 : vector<4x16xf32>
    %328 = arith.mulf %322, %327 : vector<4x16xf32>
    %c0_95 = arith.constant 0 : index
    %c112 = arith.constant 112 : index
    %329 = vector.load %arg10[%c0_95, %c112] : memref<4x128xf32, #tpu.memory_space<vmem>>, vector<4x16xf32>
    tpu.vector_store %arg10[%c0_95, %c112], %328 {strides = array<i32>} : memref<4x128xf32, #tpu.memory_space<vmem>>, vector<4x16xf32>,
    return
  }
}

</mosaic_0001>

<bundles_post_ra>
// kernel: lstm_autoencoder_forward.1
= control target key start
LH: loop header
LB: loop body
LE: loop exit
PB: predicated region body
PF: predicated region fallthrough
CT: control target
= control target key end

     0   :  { %v2087_v1 = vmov 0.0   ;;  %vm71_vm0 = vcmask 130048   ;;  %vm2088_vm1 = vmmov 0   ;;  %v2089_v6 = vmov 0   ;;  %s2566_s0 = inlined_call_operand.vmem [shape: bf16[32,16], index: 0, kind: input, shape index: {}]   ;;  %s2567_s1 = inlined_call_operand.vmem [shape: bf16[16,128], index: 1, kind: input, shape index: {}]   ;;  %s2568_s2 = inlined_call_operand.vmem [shape: bf16[32,128], index: 2, kind: input, shape index: {}]   ;;  %s2569_s3 = inlined_call_operand.vmem [shape: f32[1,128], index: 3, kind: input, shape index: {}]   ;;  %s2570_s4 = inlined_call_operand.vmem [shape: bf16[256,5], index: 4, kind: input, shape index: {}]   ;;  %s2571_s5 = inlined_call_operand.vmem [shape: f32[1,5], index: 5, kind: input, shape index: {}]   ;;  %s2572_s6 = inlined_call_operand.vmem [shape: bf16[5,512], index: 6, kind: input, shape index: {}]   ;;  %s2573_s7 = inlined_call_operand.vmem [shape: f32[1,512], index: 7, kind: input, shape index: {}]   ;;  %s2574_s8 = inlined_call_operand.vmem [shape: bf16[16,64], index: 8, kind: input, shape index: {}]   ;;  %s2575_s9 = inlined_call_operand.hbm [shape: f32[4,5], index: 9, kind: output, shape index: {0}]   ;;  %s2576_s10 = inlined_call_operand.vmem [shape: f32[4,128], index: 10, kind: output, shape index: {1}]  }
   0x1   :  { %v1972_v0 = vld [vmem:[%s2567_s1] sm:$0xff]   ;;  %1848 = vmatprep.subr.bf16.mxu1 %v2087_v1  ;;  %v1975_v4 = vld [vmem:[%s2566_s0 + $0x8] sm:$0xff]   ;;  %1852 = vmatprep.mubr.msk.bf16.mxu1 %vm2088_vm1, %v2087_v1 }
   0x2   :  { %v2161_v2 = vld [vmem:[%s2568_s2] sm:$0xff]   ;;  %1842 = vmatprep.subr.bf16.mxu0 %v1972_v0  ;;  %v2175_v5 = vld [vmem:[%s2568_s2 + $0x8] sm:$0xff]  }
   0x3   :  { %v1974_v3 = vld [vmem:[%s2566_s0] sm:$0xff]   ;;  %1849 = vmatpush3.bf16.msra.mxu1 %v2161_v2  ;;  %1843 = vmatpush3.bf16.msra.mxu0 %v1972_v0 }
   0x4   :  { %1844 = vmatprep.mubr.msk.bf16.mxu0 %vm71_vm0, %v1974_v3  ;;  %1850 = vmatprep.subr.bf16.mxu1 %v2087_v1 }
   0x5   :  { %1856 = vmatprep.subr.bf16.mxu0 %v2087_v1 }
   0x6   :  { %1845 = vmatmul.mubr.msk.bf16.vlgmr.msra.gmra.mrb[0].mxu0 %vm71_vm0, %v1975_v4 }
   0x7   :  { %1851 = vmatpush3.bf16.msra.mxu1 %v2175_v5  ;;  %1857 = vmatpush3.bf16.msra.mxu0 %v2161_v2 }
   0x8   :  { %1858 = vmatprep.subr.bf16.mxu0 %v2087_v1  ;;  %1860 = vmatprep.mubr.msk.bf16.mxu0 %vm2088_vm1, %v2087_v1 }
   0x9   :  { %1864 = vmatprep.subr.bf16.mxu1 %v2087_v1 }
   0xa   :  { %1853 = vmatmul.mubr.bf16.vlgmr.msra.gmra.mrb[0].mxu1 %v2089_v6 }
   0xb   :  { %1859 = vmatpush3.bf16.msra.mxu0 %v2175_v5  ;;  %1865 = vmatpush3.bf16.msra.mxu1 %v2161_v2 }
   0xc   :  { %1866 = vmatprep.subr.bf16.mxu1 %v2087_v1  ;;  %1868 = vmatprep.mubr.msk.bf16.mxu1 %vm2088_vm1, %v2087_v1 }
   0xd   :  { %1872 = vmatprep.subr.bf16.mxu0 %v2087_v1 }
   0xf   :  { %1867 = vmatpush3.bf16.msra.mxu1 %v2175_v5 }
  0x10   :  { %1880 = vmatprep.subr.bf16.mxu1 %v2087_v1 }
  0x11   :  { %16 = vsyncpa [#allocation4], 0  ;;  %v1731_v7 = vld [vmem:[%s2569_s3] ss:$0 sm:$0xff]  ;;  %s2090_s22 = smov 64   ;;  %s2091_s3 = smov 32  }
  0x12   :  { %vm139_vm2 = vcmask 261120   ;;  %vm208_vm3 = vcmask 257024   ;;  %vm289_vm4 = vcmask 519424   ;;  %s2092_s15 = smov 96   ;;  %vm367_vm5 = vcmask 781824   ;;  %s2096_s21 = smov 112  }
  0x13   :  { %vm446_vm6 = vcmask 1044224   ;;  %vm982_vm7 = vcmask 1041408   ;;  %vm983_vm8 = vcmask 1042432   ;;  %vm941_vm9 = vcmask 35840   ;;  %s2097_s23 = smov 48   ;;  %s2098_s24 = smov [#allocation3]  }
  0x14   :  { %vm978_vm10 = vcmask 39936   ;;  %vm1153_vm11 = vcmask 125952   ;;  %s1719_s25 = sshll.u32 %s2098_s24, 4  ;;  %vm1235_vm12 = vcmask 257152   ;;  %vm1313_vm13 = vcmask 388352   ;;  %s1720_s25 = int_to_ptr.vmem [resolvable:$true] %s1719_s25 }
  0x15   :  { %s2063_s26 = scalar_lea.vmem %s1720_s25, 64  ;;  %p2068_p1 = scmp.lt.s32.totalorder %s1720_s25, %s1720_s25 }
  0x16   :  { %p2064_p0 = scmp.ne.s32.totalorder %s1720_s25, %s2063_s26  ;;  %p2069_p2 = scmp.lt.s32.totalorder %s2063_s26, %s2063_s26 }
  0x18   :  { %p2070_p3 = por %p2069_p2, %p2068_p1 }
  0x1a   :  { %p2071_p4 = pnand %p2070_p3, %p2064_p0 }
  0xd9   :  { %v1846_v8 = vpop.f32.mrb[0].mxu0 }
  0xda   :  { %v2199_v9 = vadd.f32 %v1846_v8, %v1731_v7  ;;  %v112_v10 = vpop.f32.mrb[1].mxu0 }
  0xdb   :  { %v113_v11 = vadd.f32 %v1731_v7, %v112_v10  ;;  %v1847_v12 = vpop.f32.mrb[2].mxu0 }
  0xdc   :  { %v2201_v13 = vadd.f32 %v1847_v12, %v1731_v7  ;;  %v115_v14 = vpop.f32.mrb[3].mxu0 }
  0xdd   :  { %v2203_v15 = vadd.f32 %v1731_v7, %v115_v14  ;;  %v177_v16 = vpop.f32.mrb[0].mxu1 }
  0xde   :  { %v183_v17 = vadd.f32 %v177_v16, %v113_v11  ;;  %v1854_v18 = vpop.f32.mrb[1].mxu1 }
  0xdf   :  { %v180_v19 = vpop.f32.mrb[2].mxu1 }
  0xe0   :  { %1999 = vtanh.f32 %v183_v17  ;;  %v1855_v20 = vpop.f32.mrb[3].mxu1 }
  0xea   :  { %v2000_v21 = vpop.eup %1999 }
  0xeb   :  { %189 = vrot.lane.b32.xlu0 %v2000_v21, %s2090_s22  ;;  %v185_v22 = vmul.f32 0.5, %v2000_v21 }
  0xed   :  { %v186_v23 = vadd.f32 0.5, %v185_v22 }
  0xef   :  { %v187_v26 = vmul.f32 0.0, %v186_v23 }
 0x15d   :  { %v190_v24 = vpop.permute.xlu0 %189 }
 0x15e   :  { %v192_v25 = vmul.f32 %v190_v24, %v186_v23 }
 0x160   :  { %194 = vrot.lane.b32.xlu0 %v192_v25, %s2091_s3 }
 0x1d2   :  { %v195_v27 = vpop.permute.xlu0 %194 }
 0x1d3   :  { %v197_v28 = vadd.f32 %v195_v27, %v187_v26 }
 0x1d5   :  { %2001 = vtanh.f32 %v197_v28  ;;  %v265_v45 = vrot.slane %v197_v28, 4 }
 0x1df   :  { %v2002_v29 = vpop.eup %2001 }
 0x1e0   :  { %200 = vrot.lane.b32.xlu1 %v2002_v29, %s2090_s22 }
 0x252   :  { %v201_v30 = vpop.permute.xlu1 %200 }
 0x253   :  { %v2208_v31 = vmul.f32 %v201_v30, %v186_v23 }
 0x255   :  { %v210_v32 = vpack.c.bf16 %v2208_v31, %v2208_v31 }
 0x257   :  { %212 = vrot.lane.b32.xlu1 %v210_v32, %s2091_s3 }
 0x2c9   :  { %v213_v33 = vpop.permute.xlu1 %212 }
 0x2ca   :  { %1861 = vmatmul.mubr.msk.bf16.vlgmr.msra.gmra.mrb[4].mxu0 %vm139_vm2, %v213_v33 }
 0x2cb   :  { %1873 = vmatpush3.bf16.msra.mxu0 %v2161_v2  ;;  %1876 = vmatprep.mubr.msk.bf16.mxu0 %vm2088_vm1, %v2087_v1 }
 0x2cc   :  { %1874 = vmatprep.subr.bf16.mxu0 %v2087_v1 }
 0x2cf   :  { %1875 = vmatpush3.bf16.msra.mxu0 %v2175_v5 }
 0x2d0   :  { %1888 = vmatprep.subr.bf16.mxu0 %v2087_v1 }
 0x39d   :  { %v251_v34 = vpop.f32.mrb[4].mxu0 }
 0x39e   :  { %v258_v35 = vrot.slane %v251_v34, 4  ;;  %v1862_v36 = vpop.f32.mrb[5].mxu0 }
 0x39f   :  { %v254_v37 = vpop.f32.mrb[6].mxu0 }
 0x3a0   :  { %v260_v38 = vadd.f32 %v258_v35, %v113_v11  ;;  %v1863_v39 = vpop.f32.mrb[7].mxu0 }
 0x3a2   :  { %2003 = vtanh.f32 %v260_v38 }
 0x3ac   :  { %v2004_v40 = vpop.eup %2003 }
 0x3ad   :  { %269 = vrot.lane.b32.xlu0 %v2004_v40, %s2090_s22  ;;  %v262_v41 = vmul.f32 0.5, %v2004_v40 }
 0x3af   :  { %v263_v42 = vadd.f32 0.5, %v262_v41 }
 0x3b1   :  { %v267_v46 = vmul.f32 %v265_v45, %v263_v42 }
 0x41f   :  { %v270_v43 = vpop.permute.xlu0 %269 }
 0x420   :  { %v272_v44 = vmul.f32 %v270_v43, %v263_v42 }
 0x422   :  { %274 = vrot.lane.b32.xlu1 %v272_v44, %s2091_s3 }
 0x494   :  { %v275_v47 = vpop.permute.xlu1 %274 }
 0x495   :  { %v277_v48 = vadd.f32 %v275_v47, %v267_v46 }
 0x497   :  { %2005 = vtanh.f32 %v277_v48  ;;  %v344_v3 = vrot.slane %v277_v48, 4 }
 0x4a1   :  { %v2006_v49 = vpop.eup %2005 }
 0x4a2   :  { %280 = vrot.lane.b32.xlu0 %v2006_v49, %s2090_s22 }
 0x514   :  { %v281_v50 = vpop.permute.xlu0 %280 }
 0x515   :  { %v2223_v51 = vmul.f32 %v281_v50, %v263_v42 }
 0x517   :  { %v291_v52 = vpack.c.bf16 %v2223_v51, %v2223_v51 }
 0x519   :  { %v293_v53 = vrot.slane %v291_v52, 2 }
 0x51b   :  { %294 = vrot.lane.b32.xlu1 %v293_v53, %s2091_s3 }
 0x58d   :  { %v295_v54 = vpop.permute.xlu1 %294 }
 0x58e   :  { %1869 = vmatmul.mubr.msk.bf16.vlgmr.msra.gmra.mrb[4].mxu1 %vm139_vm2, %v295_v54 }
 0x58f   :  { %1881 = vmatpush3.bf16.msra.mxu1 %v2161_v2  ;;  %1884 = vmatprep.mubr.msk.bf16.mxu1 %vm2088_vm1, %v2087_v1 }
 0x590   :  { %1882 = vmatprep.subr.bf16.mxu1 %v2087_v1 }
 0x593   :  { %1883 = vmatpush3.bf16.msra.mxu1 %v2175_v5 }
 0x594   :  { %1896 = vmatprep.subr.bf16.mxu1 %v2087_v1 }
 0x661   :  { %v333_v55 = vpop.f32.mrb[4].mxu1 }
 0x662   :  { %v339_v56 = vadd.f32 %v333_v55, %v2203_v15  ;;  %v1870_v57 = vpop.f32.mrb[5].mxu1 }
 0x663   :  { %v336_v58 = vpop.f32.mrb[6].mxu1 }
 0x664   :  { %2007 = vtanh.f32 %v339_v56  ;;  %v1871_v59 = vpop.f32.mrb[7].mxu1 }
 0x66e   :  { %v2008_v60 = vpop.eup %2007 }
 0x66f   :  { %348 = vrot.lane.b32.xlu0 %v2008_v60, %s2090_s22  ;;  %v341_v61 = vmul.f32 0.5, %v2008_v60 }
 0x671   :  { %v342_v62 = vadd.f32 0.5, %v341_v61 }
 0x673   :  { %v346_v4 = vmul.f32 %v344_v3, %v342_v62 }
 0x6e1   :  { %v349_v63 = vpop.permute.xlu0 %348 }
 0x6e2   :  { %v351_v0 = vmul.f32 %v349_v63, %v342_v62 }
 0x6e4   :  { %353 = vrot.lane.b32.xlu1 %v351_v0, %s2091_s3 }
 0x756   :  { %v354_v7 = vpop.permute.xlu1 %353 }
 0x757   :  { %v356_v8 = vadd.f32 %v354_v7, %v346_v4 }
 0x759   :  { %2009 = vtanh.f32 %v356_v8  ;;  %v424_v28 = vrot.slane %v356_v8, 4 }
 0x763   :  { %v2010_v10 = vpop.eup %2009 }
 0x764   :  { %359 = vrot.lane.b32.xlu0 %v2010_v10, %s2090_s22 }
 0x7d6   :  { %v360_v11 = vpop.permute.xlu0 %359 }
 0x7d7   :  { %v2239_v12 = vmul.f32 %v360_v11, %v342_v62 }
 0x7d9   :  { %v369_v14 = vpack.c.bf16 %v2239_v12, %v2239_v12 }
 0x7db   :  { %371 = vrot.lane.b32.xlu1 %v369_v14, %s2091_s3 }
 0x84d   :  { %v372_v16 = vpop.permute.xlu1 %371 }
 0x84e   :  { %1877 = vmatmul.mubr.msk.bf16.vlgmr.msra.gmra.mrb[8].mxu0 %vm139_vm2, %v372_v16 }
 0x84f   :  { %1889 = vmatpush3.bf16.msra.mxu0 %v2161_v2  ;;  %1892 = vmatprep.mubr.msk.bf16.mxu0 %vm2088_vm1, %v2087_v1 }
 0x850   :  { %1890 = vmatprep.subr.bf16.mxu0 %v2087_v1 }
 0x853   :  { %1891 = vmatpush3.bf16.msra.mxu0 %v2175_v5 }
 0x854   :  { %1904 = vmatprep.subr.bf16.mxu0 %v2087_v1 }
 0x921   :  { %v410_v17 = vpop.f32.mrb[8].mxu0 }
 0x922   :  { %v417_v18 = vrot.slane %v410_v17, 4  ;;  %v1878_v19 = vpop.f32.mrb[9].mxu0 }
 0x923   :  { %v413_v20 = vpop.f32.mrb[10].mxu0 }
 0x924   :  { %v419_v21 = vadd.f32 %v417_v18, %v2203_v15  ;;  %v1879_v22 = vpop.f32.mrb[11].mxu0 }
 0x926   :  { %2011 = vtanh.f32 %v419_v21 }
 0x930   :  { %v2012_v23 = vpop.eup %2011 }
 0x931   :  { %428 = vrot.lane.b32.xlu0 %v2012_v23, %s2090_s22  ;;  %v421_v24 = vmul.f32 0.5, %v2012_v23 }
 0x933   :  { %v422_v25 = vadd.f32 0.5, %v421_v24 }
 0x935   :  { %v426_v29 = vmul.f32 %v424_v28, %v422_v25 }
 0x9a3   :  { %v429_v26 = vpop.permute.xlu0 %428 }
 0x9a4   :  { %v431_v27 = vmul.f32 %v429_v26, %v422_v25 }
 0x9a6   :  { %433 = vrot.lane.b32.xlu1 %v431_v27, %s2091_s3 }
 0xa18   :  { %v434_v30 = vpop.permute.xlu1 %433 }
 0xa19   :  { %v436_v32 = vadd.f32 %v434_v30, %v426_v29 }
 0xa1b   :  { %2013 = vtanh.f32 %v436_v32  ;;  %v501_v48 = vrot.slane %v436_v32, 4 }
 0xa25   :  { %v2014_v33 = vpop.eup %2013 }
 0xa26   :  { %439 = vrot.lane.b32.xlu0 %v2014_v33, %s2090_s22 }
 0xa98   :  { %v440_v15 = vpop.permute.xlu0 %439 }
 0xa99   :  { %v2255_v34 = vmul.f32 %v440_v15, %v422_v25 }
 0xa9b   :  { %v448_v35 = vpack.c.bf16 %v2255_v34, %v2255_v34 }
 0xa9d   :  { %v450_v36 = vrot.slane %v448_v35, 2 }
 0xa9f   :  { %451 = vrot.lane.b32.xlu1 %v450_v36, %s2091_s3 }
 0xb11   :  { %v452_v37 = vpop.permute.xlu1 %451 }
 0xb12   :  { %1885 = vmatmul.mubr.msk.bf16.vlgmr.msra.gmra.mrb[8].mxu1 %vm139_vm2, %v452_v37 }
 0xb13   :  { %1897 = vmatpush3.bf16.msra.mxu1 %v2161_v2  ;;  %1900 = vmatprep.mubr.msk.bf16.mxu1 %vm2088_vm1, %v2087_v1 }
 0xb14   :  { %1898 = vmatprep.subr.bf16.mxu1 %v2087_v1 }
 0xb17   :  { %1899 = vmatpush3.bf16.msra.mxu1 %v2175_v5 }
 0xbe5   :  { %v490_v38 = vpop.f32.mrb[8].mxu1 }
 0xbe6   :  { %v496_v39 = vadd.f32 %v490_v38, %v2199_v9  ;;  %v1886_v40 = vpop.f32.mrb[9].mxu1 }
 0xbe7   :  { %v493_v41 = vpop.f32.mrb[10].mxu1 }
 0xbe8   :  { %2015 = vtanh.f32 %v496_v39  ;;  %v1887_v42 = vpop.f32.mrb[11].mxu1 }
 0xbf2   :  { %v2016_v43 = vpop.eup %2015 }
 0xbf3   :  { %505 = vrot.lane.b32.xlu0 %v2016_v43, %s2090_s22  ;;  %v498_v44 = vmul.f32 0.5, %v2016_v43 }
 0xbf5   :  { %v499_v45 = vadd.f32 0.5, %v498_v44 }
 0xbf7   :  { %v503_v49 = vmul.f32 %v501_v48, %v499_v45 }
 0xc65   :  { %v506_v46 = vpop.permute.xlu0 %505 }
 0xc66   :  { %v508_v47 = vmul.f32 %v506_v46, %v499_v45 }
 0xc68   :  { %510 = vrot.lane.b32.xlu1 %v508_v47, %s2091_s3 }
 0xcda   :  { %v511_v50 = vpop.permute.xlu1 %510 }
 0xcdb   :  { %v513_v52 = vadd.f32 %v511_v50, %v503_v49 }
 0xcdd   :  { %2017 = vtanh.f32 %v513_v52  ;;  %v580_v8 = vrot.slane %v513_v52, 4 }
 0xce7   :  { %v2018_v53 = vpop.eup %2017 }
 0xce8   :  { %516 = vrot.lane.b32.xlu0 %v2018_v53, %s2090_s22  ;;  %v1977_v53 = vld [vmem:[%s2570_s4 + $0x40] sm:$0xff]  }
 0xce9   :  { %1804 = vmatprep.subr.bf16.mxu1 %v1977_v53 }
 0xd5a   :  { %v517_v54 = vpop.permute.xlu0 %516 }
 0xd5b   :  { %v2270_v55 = vmul.f32 %v517_v54, %v499_v45  ;;  %v1978_v54 = vld [vmem:[%s2570_s4] sm:$0xff]  }
 0xd5d   :  { %v525_v56 = vpack.c.bf16 %v2270_v55, %v2270_v55 }
 0xd5f   :  { %527 = vrot.lane.b32.xlu1 %v525_v56, %s2091_s3 }
 0xdd1   :  { %v528_v57 = vpop.permute.xlu1 %527 }
 0xdd2   :  { %1893 = vmatmul.mubr.msk.bf16.vlgmr.msra.gmra.mrb[12].mxu0 %vm139_vm2, %v528_v57  ;;  %v285_v57 = vcombine.high %v2223_v51, %v2223_v51  ;;  %v1982_v51 = vld [vmem:[%s2570_s4 + $0x10] sm:$0xff]  }
 0xdd3   :  { %1905 = vmatpush3.bf16.msra.mxu0 %v2161_v2  ;;  %1908 = vmatprep.mubr.msk.bf16.mxu0 %vm2088_vm1, %v2087_v1 }
 0xdd4   :  { %1906 = vmatprep.subr.bf16.mxu0 %v2087_v1 }
 0xdd7   :  { %1907 = vmatpush3.bf16.msra.mxu0 %v2175_v5 }
 0xea5   :  { %v566_v58 = vpop.f32.mrb[12].mxu0 }
 0xea6   :  { %v573_v59 = vrot.slane %v566_v58, 4  ;;  %v1894_v60 = vpop.f32.mrb[13].mxu0  ;;  %v1981_v58 = vld [vmem:[%s2570_s4 + $0x50] sm:$0xff]  }
 0xea7   :  { %v569_v61 = vpop.f32.mrb[14].mxu0  ;;  %v1984_v60 = vld [vmem:[%s2570_s4 + $0x18] sm:$0xff]  }
 0xea8   :  { %v575_v62 = vadd.f32 %v573_v59, %v2199_v9  ;;  %v1895_v63 = vpop.f32.mrb[15].mxu0  ;;  %v1983_v59 = vld [vmem:[%s2570_s4 + $0x58] sm:$0xff]  }
 0xeaa   :  { %2019 = vtanh.f32 %v575_v62 }
 0xeb4   :  { %v2020_v0 = vpop.eup %2019 }
 0xeb5   :  { %584 = vrot.lane.b32.xlu0 %v2020_v0, %s2090_s22  ;;  %v577_v3 = vmul.f32 0.5, %v2020_v0 }
 0xeb7   :  { %v578_v2 = vadd.f32 0.5, %v577_v3  ;;  %v1986_v3 = vld [vmem:[%s2570_s4 + $0x20] sm:$0xff]  }
 0xeb9   :  { %v582_v10 = vmul.f32 %v580_v8, %v578_v2  ;;  %v1989_v8 = vld [vmem:[%s2570_s4 + $0x70] sm:$0xff]  }
 0xf27   :  { %v585_v4 = vpop.permute.xlu0 %584 }
 0xf28   :  { %v587_v7 = vmul.f32 %v585_v4, %v578_v2  ;;  %v1987_v4 = vld [vmem:[%s2570_s4 + $0x68] sm:$0xff]  }
 0xf2a   :  { %589 = vrot.lane.b32.xlu1 %v587_v7, %s2091_s3  ;;  %v1988_v7 = vld [vmem:[%s2570_s4 + $0x28] sm:$0xff]  }
 0xf9c   :  { %v590_v5 = vpop.permute.xlu1 %589 }
 0xf9d   :  { %v592_v11 = vadd.f32 %v590_v5, %v582_v10  ;;  %v1990_v5 = vld [vmem:[%s2570_s4 + $0x30] sm:$0xff]  }
 0xf9f   :  { %2021 = vtanh.f32 %v592_v11  ;;  %v658_v30 = vrot.slane %v592_v11, 4  ;;  %v1991_v11 = vld [vmem:[%s2570_s4 + $0x78] sm:$0xff]  }
 0xfa9   :  { %v2022_v14 = vpop.eup %2021 }
 0xfaa   :  { %595 = vrot.lane.b32.xlu0 %v2022_v14, %s2090_s22  ;;  %v444_v14 = vcombine.high %v2255_v34, %v2255_v34  ;;  %v944_v34 = vld [vmem:[%s2572_s6] sm:$0x77] }
0x101c   :  { %v596_v9 = vpop.permute.xlu0 %595 }
0x101d   :  { %v598_v16 = vmul.f32 %v596_v9, %v578_v2 }
0x101f   :  { %v605_v17 = vpack.c.bf16 %v598_v16, %v598_v16  ;;  %v600_v47 = vcombine.high %v598_v16, %v598_v16  ;;  %v1992_v16 = vld [vmem:[%s2570_s4 + $0x38] sm:$0xff]  }
0x1021   :  { %v607_v18 = vrot.slane %v605_v17, 2 }
0x1023   :  { %608 = vrot.lane.b32.xlu1 %v607_v18, %s2091_s3  ;;  %v1764_v18 = vcombine.high %v944_v34, %v944_v34 }
0x1095   :  { %v609_v19 = vpop.permute.xlu1 %608 }
0x1096   :  { %1901 = vmatmul.mubr.msk.bf16.vlgmr.msra.gmra.mrb[12].mxu1 %vm139_vm2, %v609_v19  ;;  %v2093_v19 = vmov 65535  }
0x1097   :  { %1805 = vmatpush3.bf16.msra.mxu1 %v1978_v54 }
0x1169   :  { %v647_v20 = vpop.f32.mrb[12].mxu1 }
0x116a   :  { %v653_v21 = vadd.f32 %v647_v20, %v2201_v13  ;;  %v1902_v22 = vpop.f32.mrb[13].mxu1  ;;  %v984_v20 = vsel %vm982_vm7, 4294967295, %v2093_v19 }
0x116b   :  { %v650_v23 = vpop.f32.mrb[14].mxu1 }
0x116c   :  { %2023 = vtanh.f32 %v653_v21  ;;  %v1903_v24 = vpop.f32.mrb[15].mxu1  ;;  %v985_v21 = vsel %vm983_vm8, %v984_v20, 0 }
0x116d   :  { %v990_v22 = vand.u32 %v1764_v18, %v985_v21 }
0x116f   :  { %998 = vmatprep.subr.bf16.mxu0 %v990_v22 }
0x1176   :  { %v2024_v25 = vpop.eup %2023 }
0x1177   :  { %662 = vrot.lane.b32.xlu0 %v2024_v25, %s2090_s22  ;;  %v655_v26 = vmul.f32 0.5, %v2024_v25 }
0x1179   :  { %v656_v27 = vadd.f32 0.5, %v655_v26 }
0x117b   :  { %v660_v32 = vmul.f32 %v658_v30, %v656_v27 }
0x11e9   :  { %v663_v28 = vpop.permute.xlu0 %662 }
0x11ea   :  { %v665_v29 = vmul.f32 %v663_v28, %v656_v27 }
0x11ec   :  { %667 = vrot.lane.b32.xlu1 %v665_v29, %s2091_s3 }
0x125e   :  { %v668_v33 = vpop.permute.xlu1 %667 }
0x125f   :  { %v670_v15 = vadd.f32 %v668_v33, %v660_v32  ;;  %v1763_v32 = vcombine.low %v944_v34, %v944_v34 }
0x1261   :  { %2025 = vtanh.f32 %v670_v15  ;;  %v737_v61 = vrot.slane %v670_v15, 4  ;;  %v987_v33 = vand.u32 %v1763_v32, %v985_v21  ;;  %v945_v15 = vld [vmem:[%s2572_s6 + $0x8] sm:$0x77] }
0x126b   :  { %v2026_v35 = vpop.eup %2025 }
0x126c   :  { %673 = vrot.lane.b32.xlu0 %v2026_v35, %s2090_s22  ;;  %v1766_v35 = vcombine.high %v945_v15, %v945_v15 }
0x12de   :  { %v674_v36 = vpop.permute.xlu0 %673 }
0x12df   :  { %v2291_v37 = vmul.f32 %v674_v36, %v656_v27  ;;  %v996_v36 = vand.u32 %v1766_v35, %v985_v21 }
0x12e1   :  { %v682_v38 = vpack.c.bf16 %v2291_v37, %v2291_v37 }
0x12e3   :  { %684 = vrot.lane.b32.xlu1 %v682_v38, %s2091_s3 }
0x1355   :  { %v685_v39 = vpop.permute.xlu1 %684 }
0x1356   :  { %1909 = vmatmul.mubr.msk.bf16.vlgmr.msra.gmra.mrb[16].mxu0 %vm139_vm2, %v685_v39  ;;  %v1746_v39 = vld [vmem:[%s2571_s5] ss:$0 sm:$0xff] }
0x1357   :  { %1030 = vmatprep.mubr.bf16.mxu0 %v2089_v6  ;;  %999 = vmatpush1.bf16.msra.mxu0 %v987_v33 }
0x1358   :  { %1039 = vmatprep.subr.bf16.mxu0 %v996_v36 }
0x1429   :  { %v723_v40 = vpop.f32.mrb[16].mxu0 }
0x142a   :  { %v730_v41 = vrot.slane %v723_v40, 4  ;;  %v1910_v42 = vpop.f32.mrb[17].mxu0 }
0x142b   :  { %v726_v43 = vpop.f32.mrb[18].mxu0 }
0x142c   :  { %v732_v44 = vadd.f32 %v730_v41, %v2201_v13  ;;  %v1911_v45 = vpop.f32.mrb[19].mxu0  ;;  %v1765_v41 = vcombine.low %v945_v15, %v945_v15 }
0x142e   :  { %2027 = vtanh.f32 %v732_v44 }
0x1438   :  { %v2028_v46 = vpop.eup %2027 }
0x1439   :  { %741 = vrot.lane.b32.xlu0 %v2028_v46, %s2090_s22  ;;  %v734_v48 = vmul.f32 0.5, %v2028_v46  ;;  %v993_v46 = vand.u32 %v1765_v41, %v985_v21 }
0x143b   :  { %v2303_v49 = vadd.f32 0.5, %v734_v48  ;;  %v948_v48 = vlaneseq }
0x143d   :  { %521 = vrot.lane.b32.xlu0 %v2270_v55, %s2091_s3  ;;  %v1979_v55 = vld [vmem:[%s2570_s4 + $0x48] sm:$0xff]   ;;  %v739_v62 = vmul.f32 %v737_v61, %v2303_v49 }
0x143e   :  { %1806 = vmatprep.subr.bf16.mxu1 %v1979_v55 }
0x1441   :  { %601 = vrot.lane.b32.xlu0 %v600_v47, %s2090_s22 }
0x14ab   :  { %v742_v50 = vpop.permute.xlu0 %741 }
0x14ac   :  { %v744_v52 = vmul.f32 %v742_v50, %v2303_v49 }
0x14ae   :  { %746 = vrot.lane.b32.xlu1 %v744_v52, %s2091_s3 }
0x14af   :  { %v522_v13 = vpop.permute.xlu0 %521 }
0x14b0   :  { %524 = vst.msk [vmem:[#allocation2 + $0x4] sm:$0xf] %vm208_vm3, %v522_v13  ;;  %v2409_v13 = vshrl.u32 %v948_v48, 7 }
0x14b2   :  { %205 = vrot.lane.b32.xlu1 %v2208_v31, %s2091_s3  ;;  %v1980_v31 = vld [vmem:[%s2570_s4 + $0x8] sm:$0xff]   ;;  %v950_v54 = vsub.s32 0, %v2409_v13 }
0x14b3   :  { %v602_v56 = vpop.permute.xlu0 %601  ;;  %1807 = vmatpush3.bf16.msra.mxu1 %v1980_v31 }
0x14b4   :  { %604 = vst.msk [vmem:[#allocation2 + $0x4] sm:$0xf] %vm289_vm4, %v602_v56  ;;  %1808 = vmatprep.subr.bf16.mxu1 %v1981_v58 }
0x14b6   :  { %286 = vrot.lane.b32.xlu1 %v285_v57, %s2090_s22 }
0x14b7   :  { %1809 = vmatpush3.bf16.msra.mxu1 %v1982_v51 }
0x14b8   :  { %1810 = vmatprep.subr.bf16.mxu1 %v1983_v59 }
0x14ba   :  { %364 = vrot.lane.b32.xlu1 %v2239_v12, %s2092_s15  ;;  %v1985_v12 = vld [vmem:[%s2570_s4 + $0x60] sm:$0xff]  }
0x14bb   :  { %1811 = vmatpush3.bf16.msra.mxu1 %v1984_v60 }
0x14bc   :  { %1812 = vmatprep.subr.bf16.mxu1 %v1985_v12 }
0x14bf   :  { %1813 = vmatpush3.bf16.msra.mxu1 %v1986_v3 }
0x14c0   :  { %1814 = vmatprep.subr.bf16.mxu1 %v1987_v4 }
0x14c3   :  { %1815 = vmatpush3.bf16.msra.mxu1 %v1988_v7 }
0x14c4   :  { %1816 = vmatprep.subr.bf16.mxu1 %v1989_v8 }
0x14c7   :  { %1817 = vmatpush3.bf16.msra.mxu1 %v1990_v5 }
0x14c8   :  { %1818 = vmatprep.subr.bf16.mxu1 %v1991_v11 }
0x14cb   :  { %1819 = vmatpush3.bf16.msra.mxu1 %v1992_v16 }
0x14cc   :  { %1924 = vmatprep.subr.bf16.mxu1 %v2087_v1 }
0x1520   :  { %v747_v63 = vpop.permute.xlu1 %746 }
0x1521   :  { %v749_v0 = vadd.f32 %v747_v63, %v739_v62 }
0x1523   :  { %2029 = vtanh.f32 %v749_v0 }
0x1524   :  { %v206_v2 = vpop.permute.xlu1 %205 }
0x1525   :  { %209 = vst.msk [vmem:[#allocation2] sm:$0xf] %vm208_vm3, %v206_v2 }
0x1528   :  { %v287_v10 = vpop.permute.xlu1 %286 }
0x1529   :  { %290 = vst.msk [vmem:[#allocation2] sm:$0xf] %vm289_vm4, %v287_v10 }
0x152c   :  { %v365_v9 = vpop.permute.xlu1 %364 }
0x152d   :  { %v2030_v17 = vpop.eup %2029  ;;  %368 = vst.msk [vmem:[#allocation2] sm:$0xf] %vm367_vm5, %v365_v9 }
0x152e   :  { %447 = vst.msk [vmem:[#allocation2] sm:$0xf] %vm446_vm6, %v444_v14  ;;  %752 = vrot.lane.b32.xlu0 %v2030_v17, %s2090_s22 }
0x1532   :  { %678 = vrot.lane.b32.xlu0 %v2291_v37, %s2092_s15  ;;  %v2389_v37 = vld [vmem:[%s2574_s8] sm:$0xff]   ;;  %s2095_s8 = smov 80  }
0x15a0   :  { %v753_v23 = vpop.permute.xlu0 %752 }
0x15a1   :  { %v755_v24 = vmul.f32 %v753_v23, %v2303_v49 }
0x15a3   :  { %v757_v25 = vcombine.high %v755_v24, %v755_v24 }
0x15a4   :  { %v679_v26 = vpop.permute.xlu0 %678 }
0x15a5   :  { %681 = vst.msk [vmem:[#allocation2 + $0x4] sm:$0xf] %vm367_vm5, %v679_v26 }
0x15a6   :  { %759 = vst.msk [vmem:[#allocation2 + $0x4] sm:$0xf] %vm446_vm6, %v757_v25 }
0x15ad   :  { %v760_v27 = vld [vmem:[#allocation2] sm:$0xff] }
0x15ae   :  { %v762_v28 = vcombine.high %v760_v27, %v760_v27  ;;  %v764_v30 = vpack.c.bf16 %v760_v27, %v760_v27 }
0x15b0   :  { %v765_v29 = vpack.c.bf16 %v762_v28, %v762_v28 }
0x15b2   :  { %933 = vmatprep.mubr.bf16.mxu1 %v765_v29 }
0x15b3   :  { %934 = vmatmul.mubr.bf16.vlgmr.msra.gmra.mrb[16].mxu1 %v764_v30 }
0x15b4   :  { %1926 = vmatprep.mubr.msk.bf16.mxu1 %vm2088_vm1, %v2087_v1  ;;  %1925 = vmatpush3.bf16.msra.mxu1 %v2389_v37 }
0x15b5   :  { %1936 = vmatprep.subr.bf16.mxu1 %v2087_v1 }
0x1686   :  { %v1820_v38 = vpop.f32.mrb[16].mxu1 }
0x1687   :  { %v1821_v40 = vpop.f32.mrb[17].mxu1 }
0x1688   :  { %v1822_v42 = vadd.f32 %v1821_v40, %v1820_v38  ;;  %v1823_v43 = vpop.f32.mrb[18].mxu1  ;;  %v954_v38 = vsub.s32 1, %v2409_v13 }
0x1689   :  { %v1824_v44 = vpop.f32.mrb[19].mxu1 }
0x168a   :  { %v936_v45 = vadd.f32 %v1822_v42, %v1746_v39 }
0x168c   :  { %v943_v47 = vpack.c.bf16 %v936_v45, %v936_v45  ;;  %942 = vst.msk [vmem:[#allocation3] sm:$0xf] %vm941_vm9, %v936_v45 }
0x168e   :  { %1767 = vmatmul.mubr.msk.bf16.vlgmr.msra.gmra.mrb[20].mxu0 %vm978_vm10, %v943_v47 }
0x168f   :  { %1040 = vmatpush1.bf16.msra.mxu0 %v993_v46  ;;  %1071 = vmatprep.mubr.bf16.mxu0 %v2089_v6 }
0x1690   :  { %1912 = vmatprep.subr.bf16.mxu0 %v2087_v1 }
0x1696   :  { %1768 = vmatmul.mubr.msk.bf16.vlgmr.msra.gmra.mrb[24].mxu0 %vm978_vm10, %v943_v47 }
0x1697   :  { %1913 = vmatpush3.bf16.msra.mxu0 %v2389_v37  ;;  %1914 = vmatprep.mubr.msk.bf16.mxu0 %vm2088_vm1, %v2087_v1 }
0x1698   :  { %1918 = vmatprep.subr.bf16.mxu0 %v2087_v1 }
0x169e   :  { %1915 = vmatmul.mubr.bf16.vlgmr.msra.gmra.mrb[28].mxu0 %v2089_v6  ;;  %v2415_v6 = vld [vmem:[%s2573_s7] sm:$0xf]  ;;  %s2094_s7 = smov 16  }
0x169f   :  { %1919 = vmatpush3.bf16.msra.mxu0 %v2389_v37  ;;  %1920 = vmatprep.mubr.msk.bf16.mxu0 %vm2088_vm1, %v2087_v1  ;;  %v951_v31 = vrot.slane %v2415_v6, %v950_v54  ;;  %v955_v39 = vrot.slane %v2415_v6, %v954_v38 }
0x16a0   :  { %1930 = vmatprep.subr.bf16.mxu0 %v2087_v1 }
0x1761   :  { %v1032_v49 = vpop.f32.mrb[20].mxu0 }
0x1762   :  { %v2407_v50 = vpop.f32.mrb[21].mxu0  ;;  %v1033_v51 = vadd.f32 %v1032_v49, %v951_v31 }
0x1763   :  { %v1036_v52 = vpop.f32.mrb[22].mxu0  ;;  %v1035_v40 = vadd.f32 %v2407_v50, %v955_v39 }
0x1764   :  { %v1037_v53 = vpop.f32.mrb[23].mxu0 }
0x1769   :  { %v2417_v55 = vpop.f32.mrb[24].mxu0 }
0x176a   :  { %v2419_v56 = vpop.f32.mrb[25].mxu0 }
0x176b   :  { %v1077_v57 = vpop.f32.mrb[26].mxu0 }
0x176c   :  { %v1078_v58 = vpop.f32.mrb[27].mxu0 }
0x1771   :  { %v1122_v59 = vpop.f32.mrb[28].mxu0 }
0x1772   :  { %v1128_v60 = vadd.f32 %v1122_v59, %v1033_v51  ;;  %v1916_v61 = vpop.f32.mrb[29].mxu0 }
0x1773   :  { %v1125_v62 = vpop.f32.mrb[30].mxu0 }
0x1774   :  { %2031 = vtanh.f32 %v1128_v60  ;;  %v1917_v63 = vpop.f32.mrb[31].mxu0 }
0x177e   :  { %v2032_v0 = vpop.eup %2031 }
0x177f   :  { %1134 = vrot.lane.b32.xlu1 %v2032_v0, %s2092_s15  ;;  %v1130_v12 = vmul.f32 0.5, %v2032_v0 }
0x1781   :  { %v1131_v3 = vadd.f32 0.5, %v1130_v12 }
0x1783   :  { %v1132_v7 = vmul.f32 0.0, %v1131_v3 }
0x17f1   :  { %v1135_v2 = vpop.permute.xlu1 %1134 }
0x17f2   :  { %v1137_v4 = vmul.f32 %v1135_v2, %v1131_v3 }
0x17f4   :  { %1139 = vrot.lane.b32.xlu0 %v1137_v4, %s2094_s7 }
0x1866   :  { %v1140_v8 = vpop.permute.xlu0 %1139 }
0x1867   :  { %v1142_v10 = vadd.f32 %v1140_v8, %v1132_v7 }
0x1869   :  { %2033 = vtanh.f32 %v1142_v10 }
0x1873   :  { %v2034_v5 = vpop.eup %2033 }
0x1874   :  { %1145 = vrot.lane.b32.xlu1 %v2034_v5, %s2091_s3 }
0x18e6   :  { %v1146_v11 = vpop.permute.xlu1 %1145 }
0x18e7   :  { %v2425_v14 = vmul.f32 %v1146_v11, %v1131_v3 }
0x18e9   :  { %v1155_v9 = vpack.c.bf16 %v2425_v14, %v2425_v14 }
0x18eb   :  { %1157 = vrot.lane.b32.xlu0 %v1155_v9, %s2095_s8 }
0x195d   :  { %v1158_v16 = vpop.permute.xlu0 %1157 }
0x195e   :  { %1921 = vmatmul.mubr.msk.bf16.vlgmr.msra.gmra.mrb[32].mxu0 %vm71_vm0, %v1158_v16 }
0x195f   :  { %1931 = vmatpush3.bf16.msra.mxu0 %v2389_v37  ;;  %1932 = vmatprep.mubr.msk.bf16.mxu0 %vm2088_vm1, %v2087_v1 }
0x1960   :  { %1942 = vmatprep.subr.bf16.mxu0 %v2087_v1 }
0x1a31   :  { %v1196_v17 = vpop.f32.mrb[32].mxu0 }
0x1a32   :  { %1203 = vrot.lane.b32.xlu1 %v1196_v17, %s2090_s22  ;;  %v1922_v34 = vpop.f32.mrb[33].mxu0 }
0x1a33   :  { %v1199_v18 = vpop.f32.mrb[34].mxu0 }
0x1a34   :  { %v1923_v19 = vpop.f32.mrb[35].mxu0 }
0x1a36   :  { %1211 = vrot.lane.b32.xlu1 %v1142_v10, %s2090_s22 }
0x1aa4   :  { %v1204_v20 = vpop.permute.xlu1 %1203 }
0x1aa5   :  { %v1206_v21 = vadd.f32 %v1204_v20, %v1033_v51 }
0x1aa7   :  { %2035 = vtanh.f32 %v1206_v21  ;;  %v958_v21 = vsub.s32 2, %v2409_v13 }
0x1aa8   :  { %v1212_v27 = vpop.permute.xlu1 %1211 }
0x1ab1   :  { %v2036_v22 = vpop.eup %2035 }
0x1ab2   :  { %1216 = vrot.lane.b32.xlu0 %v2036_v22, %s2092_s15  ;;  %v1208_v23 = vmul.f32 0.5, %v2036_v22  ;;  %v959_v22 = vrot.slane %v2415_v6, %v958_v21 }
0x1ab4   :  { %v1209_v24 = vadd.f32 0.5, %v1208_v23  ;;  %v1074_v23 = vadd.f32 %v2417_v55, %v959_v22 }
0x1ab6   :  { %v1214_v28 = vmul.f32 %v1212_v27, %v1209_v24 }
0x1b24   :  { %v1217_v25 = vpop.permute.xlu0 %1216 }
0x1b25   :  { %v1219_v26 = vmul.f32 %v1217_v25, %v1209_v24 }
0x1b27   :  { %1221 = vrot.lane.b32.xlu0 %v1219_v26, %s2094_s7 }
0x1b99   :  { %v1222_v29 = vpop.permute.xlu0 %1221 }
0x1b9a   :  { %v1224_v30 = vadd.f32 %v1222_v29, %v1214_v28 }
0x1b9c   :  { %2037 = vtanh.f32 %v1224_v30 }
0x1ba6   :  { %v2038_v32 = vpop.eup %2037 }
0x1ba7   :  { %1227 = vrot.lane.b32.xlu1 %v2038_v32, %s2091_s3 }
0x1c19   :  { %v1228_v33 = vpop.permute.xlu1 %1227 }
0x1c1a   :  { %v2440_v15 = vmul.f32 %v1228_v33, %v1209_v24 }
0x1c1c   :  { %v1237_v35 = vpack.c.bf16 %v2440_v15, %v2440_v15 }
0x1c1e   :  { %1239 = vrot.lane.b32.xlu0 %v1237_v35, %s2094_s7 }
0x1c22   :  { %1289 = vrot.lane.b32.xlu0 %v1224_v30, %s2090_s22 }
0x1c90   :  { %v1240_v36 = vpop.permute.xlu0 %1239 }
0x1c91   :  { %1927 = vmatmul.mubr.msk.bf16.vlgmr.msra.gmra.mrb[20].mxu1 %vm71_vm0, %v1240_v36 }
0x1c92   :  { %1937 = vmatpush3.bf16.msra.mxu1 %v2389_v37  ;;  %1938 = vmatprep.mubr.msk.bf16.mxu1 %vm2088_vm1, %v2087_v1 }
0x1c93   :  { %1948 = vmatprep.subr.bf16.mxu1 %v2087_v1 }
0x1c94   :  { %v1290_v53 = vpop.permute.xlu0 %1289 }
0x1d64   :  { %v1278_v41 = vpop.f32.mrb[20].mxu1 }
0x1d65   :  { %v1284_v42 = vadd.f32 %v1278_v41, %v1035_v40  ;;  %v1928_v43 = vpop.f32.mrb[21].mxu1 }
0x1d66   :  { %v1281_v44 = vpop.f32.mrb[22].mxu1 }
0x1d67   :  { %2039 = vtanh.f32 %v1284_v42  ;;  %v1929_v45 = vpop.f32.mrb[23].mxu1 }
0x1d71   :  { %v2040_v46 = vpop.eup %2039 }
0x1d72   :  { %1294 = vrot.lane.b32.xlu1 %v2040_v46, %s2092_s15  ;;  %v1286_v47 = vmul.f32 0.5, %v2040_v46 }
0x1d74   :  { %v1287_v48 = vadd.f32 0.5, %v1286_v47 }
0x1d76   :  { %v1292_v54 = vmul.f32 %v1290_v53, %v1287_v48 }
0x1de4   :  { %v1295_v49 = vpop.permute.xlu1 %1294 }
0x1de5   :  { %v1297_v52 = vmul.f32 %v1295_v49, %v1287_v48 }
0x1de7   :  { %1299 = vrot.lane.b32.xlu1 %v1297_v52, %s2094_s7 }
0x1e59   :  { %v1300_v57 = vpop.permute.xlu1 %1299 }
0x1e5a   :  { %v1302_v31 = vadd.f32 %v1300_v57, %v1292_v54 }
0x1e5c   :  { %2041 = vtanh.f32 %v1302_v31 }
0x1e66   :  { %v2042_v50 = vpop.eup %2041 }
0x1e67   :  { %1305 = vrot.lane.b32.xlu0 %v2042_v50, %s2091_s3 }
0x1ed9   :  { %v1306_v58 = vpop.permute.xlu0 %1305 }
0x1eda   :  { %v2457_v51 = vmul.f32 %v1306_v58, %v1287_v48 }
0x1edc   :  { %v1315_v59 = vpack.c.bf16 %v2457_v51, %v2457_v51 }
0x1ede   :  { %1317 = vrot.lane.b32.xlu1 %v1315_v59, %s2095_s8 }
0x1f50   :  { %v1318_v60 = vpop.permute.xlu1 %1317 }
0x1f51   :  { %1933 = vmatmul.mubr.msk.bf16.vlgmr.msra.gmra.mrb[36].mxu0 %vm71_vm0, %v1318_v60 }
0x1f52   :  { %1943 = vmatpush3.bf16.msra.mxu0 %v2389_v37  ;;  %1944 = vmatprep.mubr.msk.bf16.mxu0 %vm2088_vm1, %v2087_v1 }
0x1f53   :  { %1954 = vmatprep.subr.bf16.mxu0 %v2087_v1 }
0x2024   :  { %v1356_v61 = vpop.f32.mrb[36].mxu0 }
0x2025   :  { %1363 = vrot.lane.b32.xlu0 %v1356_v61, %s2090_s22  ;;  %v1934_v62 = vpop.f32.mrb[37].mxu0 }
0x2026   :  { %v1359_v63 = vpop.f32.mrb[38].mxu0 }
0x2027   :  { %v1935_v0 = vpop.f32.mrb[39].mxu0 }
0x2029   :  { %1371 = vrot.lane.b32.xlu0 %v1302_v31, %s2090_s22 }
0x2097   :  { %v1364_v12 = vpop.permute.xlu0 %1363 }
0x2098   :  { %v1366_v3 = vadd.f32 %v1364_v12, %v1035_v40  ;;  %v962_v12 = vsub.s32 3, %v2409_v13 }
0x209a   :  { %2043 = vtanh.f32 %v1366_v3  ;;  %v963_v3 = vrot.slane %v2415_v6, %v962_v12 }
0x209b   :  { %v1372_v5 = vpop.permute.xlu0 %1371 }
0x20a4   :  { %v2044_v2 = vpop.eup %2043 }
0x20a5   :  { %1376 = vrot.lane.b32.xlu1 %v2044_v2, %s2092_s15  ;;  %v1368_v4 = vmul.f32 0.5, %v2044_v2  ;;  %v1076_v2 = vadd.f32 %v2419_v56, %v963_v3 }
0x20a7   :  { %v1369_v7 = vadd.f32 0.5, %v1368_v4 }
0x20a9   :  { %v1374_v11 = vmul.f32 %v1372_v5, %v1369_v7 }
0x2117   :  { %v1377_v8 = vpop.permute.xlu1 %1376 }
0x2118   :  { %v1379_v10 = vmul.f32 %v1377_v8, %v1369_v7 }
0x211a   :  { %1381 = vrot.lane.b32.xlu1 %v1379_v10, %s2094_s7 }
0x218c   :  { %v1382_v9 = vpop.permute.xlu1 %1381 }
0x218d   :  { %v1384_v16 = vadd.f32 %v1382_v9, %v1374_v11 }
0x218f   :  { %2045 = vtanh.f32 %v1384_v16 }
0x2199   :  { %v2046_v17 = vpop.eup %2045 }
0x219a   :  { %1387 = vrot.lane.b32.xlu0 %v2046_v17, %s2091_s3 }
0x220c   :  { %v1388_v34 = vpop.permute.xlu0 %1387 }
0x220d   :  { %v2472_v18 = vmul.f32 %v1388_v34, %v1369_v7 }
0x220f   :  { %v1397_v19 = vpack.c.bf16 %v2472_v18, %v2472_v18 }
0x2211   :  { %1399 = vrot.lane.b32.xlu1 %v1397_v19, %s2094_s7 }
0x2215   :  { %1449 = vrot.lane.b32.xlu1 %v1384_v16, %s2090_s22 }
0x2283   :  { %v1400_v20 = vpop.permute.xlu1 %1399 }
0x2284   :  { %1939 = vmatmul.mubr.msk.bf16.vlgmr.msra.gmra.mrb[24].mxu1 %vm71_vm0, %v1400_v20 }
0x2285   :  { %1949 = vmatpush3.bf16.msra.mxu1 %v2389_v37  ;;  %1950 = vmatprep.mubr.msk.bf16.mxu1 %vm2088_vm1, %v2087_v1 }
0x2287   :  { %v1450_v36 = vpop.permute.xlu1 %1449 }
0x2357   :  { %v1438_v24 = vpop.f32.mrb[24].mxu1 }
0x2358   :  { %v1444_v25 = vadd.f32 %v1438_v24, %v1074_v23  ;;  %v1940_v26 = vpop.f32.mrb[25].mxu1 }
0x2359   :  { %v1441_v27 = vpop.f32.mrb[26].mxu1 }
0x235a   :  { %2047 = vtanh.f32 %v1444_v25  ;;  %v1941_v28 = vpop.f32.mrb[27].mxu1 }
0x2364   :  { %v2048_v29 = vpop.eup %2047 }
0x2365   :  { %1454 = vrot.lane.b32.xlu0 %v2048_v29, %s2092_s15  ;;  %v1446_v30 = vmul.f32 0.5, %v2048_v29 }
0x2367   :  { %v1447_v32 = vadd.f32 0.5, %v1446_v30 }
0x2369   :  { %v1452_v38 = vmul.f32 %v1450_v36, %v1447_v32 }
0x23d7   :  { %v1455_v33 = vpop.permute.xlu0 %1454 }
0x23d8   :  { %v1457_v35 = vmul.f32 %v1455_v33, %v1447_v32 }
0x23da   :  { %1459 = vrot.lane.b32.xlu0 %v1457_v35, %s2094_s7 }
0x244c   :  { %v1460_v39 = vpop.permute.xlu0 %1459 }
0x244d   :  { %v1462_v40 = vadd.f32 %v1460_v39, %v1452_v38 }
0x244f   :  { %2049 = vtanh.f32 %v1462_v40 }
0x2459   :  { %v2050_v55 = vpop.eup %2049 }
0x245a   :  { %1465 = vrot.lane.b32.xlu1 %v2050_v55, %s2091_s3 }
0x24cc   :  { %v1466_v41 = vpop.permute.xlu1 %1465 }
0x24cd   :  { %v2488_v42 = vmul.f32 %v1466_v41, %v1447_v32 }
0x24cf   :  { %v1475_v43 = vpack.c.bf16 %v2488_v42, %v2488_v42 }
0x24d1   :  { %1477 = vrot.lane.b32.xlu0 %v1475_v43, %s2095_s8 }
0x2543   :  { %v1478_v44 = vpop.permute.xlu0 %1477 }
0x2544   :  { %1945 = vmatmul.mubr.msk.bf16.vlgmr.msra.gmra.mrb[40].mxu0 %vm71_vm0, %v1478_v44 }
0x2545   :  { %1955 = vmatpush3.bf16.msra.mxu0 %v2389_v37  ;;  %1956 = vmatprep.mubr.msk.bf16.mxu0 %vm2088_vm1, %v2087_v1 }
0x2617   :  { %v1516_v45 = vpop.f32.mrb[40].mxu0 }
0x2618   :  { %1523 = vrot.lane.b32.xlu1 %v1516_v45, %s2090_s22  ;;  %v1946_v46 = vpop.f32.mrb[41].mxu0 }
0x2619   :  { %v1519_v47 = vpop.f32.mrb[42].mxu0 }
0x261a   :  { %v1947_v48 = vpop.f32.mrb[43].mxu0 }
0x261c   :  { %1531 = vrot.lane.b32.xlu1 %v1462_v40, %s2090_s22 }
0x268a   :  { %v1524_v49 = vpop.permute.xlu1 %1523 }
0x268b   :  { %v1526_v52 = vadd.f32 %v1524_v49, %v1074_v23 }
0x268d   :  { %2051 = vtanh.f32 %v1526_v52 }
0x268e   :  { %v1532_v1 = vpop.permute.xlu1 %1531 }
0x2697   :  { %v2052_v53 = vpop.eup %2051 }
0x2698   :  { %1536 = vrot.lane.b32.xlu0 %v2052_v53, %s2092_s15  ;;  %v1528_v54 = vmul.f32 0.5, %v2052_v53 }
0x269a   :  { %v1529_v57 = vadd.f32 0.5, %v1528_v54 }
0x269c   :  { %v1534_v50 = vmul.f32 %v1532_v1, %v1529_v57 }
0x270a   :  { %v1537_v37 = vpop.permute.xlu0 %1536 }
0x270b   :  { %v1539_v31 = vmul.f32 %v1537_v37, %v1529_v57 }
0x270d   :  { %1541 = vrot.lane.b32.xlu0 %v1539_v31, %s2094_s7 }
0x277f   :  { %v1542_v58 = vpop.permute.xlu0 %1541 }
0x2780   :  { %v1544_v59 = vadd.f32 %v1542_v58, %v1534_v50 }
0x2782   :  { %2053 = vtanh.f32 %v1544_v59 }
0x278c   :  { %v2054_v60 = vpop.eup %2053 }
0x278d   :  { %1547 = vrot.lane.b32.xlu1 %v2054_v60, %s2091_s3 }
0x27ff   :  { %v1548_v61 = vpop.permute.xlu1 %1547 }
0x2800   :  { %v1550_v62 = vmul.f32 %v1548_v61, %v1529_v57 }
0x2802   :  { %v1557_v63 = vpack.c.bf16 %v1550_v62, %v1550_v62 }
0x2804   :  { %1559 = vrot.lane.b32.xlu0 %v1557_v63, %s2094_s7 }
0x2808   :  { %1609 = vrot.lane.b32.xlu0 %v1544_v59, %s2090_s22 }
0x2876   :  { %v1560_v0 = vpop.permute.xlu0 %1559 }
0x2877   :  { %1951 = vmatmul.mubr.msk.bf16.vlgmr.msra.gmra.mrb[28].mxu1 %vm71_vm0, %v1560_v0 }
0x287a   :  { %v1610_v13 = vpop.permute.xlu0 %1609 }
0x294a   :  { %v1598_v4 = vpop.f32.mrb[28].mxu1 }
0x294b   :  { %v1604_v7 = vadd.f32 %v1598_v4, %v1076_v2  ;;  %v1952_v8 = vpop.f32.mrb[29].mxu1 }
0x294c   :  { %v1601_v10 = vpop.f32.mrb[30].mxu1 }
0x294d   :  { %2055 = vtanh.f32 %v1604_v7  ;;  %v1953_v5 = vpop.f32.mrb[31].mxu1 }
0x2957   :  { %v2056_v11 = vpop.eup %2055 }
0x2958   :  { %1614 = vrot.lane.b32.xlu1 %v2056_v11, %s2092_s15  ;;  %v1606_v9 = vmul.f32 0.5, %v2056_v11 }
0x295a   :  { %v1607_v16 = vadd.f32 0.5, %v1606_v9 }
0x295c   :  { %v1612_v19 = vmul.f32 %v1610_v13, %v1607_v16 }
0x29ca   :  { %v1615_v17 = vpop.permute.xlu1 %1614 }
0x29cb   :  { %v1617_v34 = vmul.f32 %v1615_v17, %v1607_v16 }
0x29cd   :  { %1619 = vrot.lane.b32.xlu1 %v1617_v34, %s2094_s7 }
0x2a3f   :  { %v1620_v6 = vpop.permute.xlu1 %1619 }
0x2a40   :  { %v1622_v20 = vadd.f32 %v1620_v6, %v1612_v19 }
0x2a42   :  { %2057 = vtanh.f32 %v1622_v20 }
0x2a4c   :  { %v2058_v56 = vpop.eup %2057 }
0x2a4d   :  { %1625 = vrot.lane.b32.xlu0 %v2058_v56, %s2091_s3 }
0x2abf   :  { %v1626_v21 = vpop.permute.xlu0 %1625 }
0x2ac0   :  { %v1628_v22 = vmul.f32 %v1626_v21, %v1607_v16 }
0x2ac2   :  { %v1635_v23 = vpack.c.bf16 %v1628_v22, %v1628_v22 }
0x2ac4   :  { %1637 = vrot.lane.b32.xlu1 %v1635_v23, %s2095_s8 }
0x2b36   :  { %v1638_v24 = vpop.permute.xlu1 %1637 }
0x2b37   :  { %1957 = vmatmul.mubr.msk.bf16.vlgmr.msra.gmra.mrb[44].mxu0 %vm71_vm0, %v1638_v24 }
0x2c0a   :  { %v1676_v25 = vpop.f32.mrb[44].mxu0 }
0x2c0b   :  { %1683 = vrot.lane.b32.xlu0 %v1676_v25, %s2090_s22  ;;  %v1958_v26 = vpop.f32.mrb[45].mxu0 }
0x2c0c   :  { %v1679_v27 = vpop.f32.mrb[46].mxu0 }
0x2c0d   :  { %v1959_v28 = vpop.f32.mrb[47].mxu0 }
0x2c0f   :  { %1691 = vrot.lane.b32.xlu0 %v1622_v20, %s2090_s22 }
0x2c13   :  { %1150 = vrot.lane.b32.xlu0 %v2425_v14, %s2095_s8 }
0x2c17   :  { %1310 = vrot.lane.b32.xlu0 %v2457_v51, %s2096_s21 }
0x2c1b   :  { %1470 = vrot.lane.b32.xlu0 %v2488_v42, %s2094_s7 }
0x2c7d   :  { %v1684_v29 = vpop.permute.xlu0 %1683 }
0x2c7e   :  { %v1686_v30 = vadd.f32 %v1684_v29, %v1076_v2 }
0x2c80   :  { %2059 = vtanh.f32 %v1686_v30 }
0x2c81   :  { %v1692_v32 = vpop.permute.xlu0 %1691 }
0x2c85   :  { %v1151_v33 = vpop.permute.xlu0 %1150 }
0x2c86   :  { %1154 = vst.msk [vmem:[%s2576_s10] sm:$0xf] %vm1153_vm11, %v1151_v33 }
0x2c89   :  { %v1311_v41 = vpop.permute.xlu0 %1310 }
0x2c8a   :  { %v2060_v35 = vpop.eup %2059 }
0x2c8b   :  { %1696 = vrot.lane.b32.xlu1 %v2060_v35, %s2092_s15  ;;  %v1688_v14 = vmul.f32 0.5, %v2060_v35 }
0x2c8d   :  { %v1689_v36 = vadd.f32 0.5, %v1688_v14 }
0x2c8f   :  { %v1694_v39 = vmul.f32 %v1692_v32, %v1689_v36 }
0x2cfd   :  { %v1697_v38 = vpop.permute.xlu1 %1696 }
0x2cfe   :  { %v1699_v51 = vmul.f32 %v1697_v38, %v1689_v36 }
0x2d00   :  { %1701 = vrot.lane.b32.xlu1 %v1699_v51, %s2094_s7 }
0x2d04   :  { %1232 = vrot.lane.b32.xlu1 %v2440_v15, %s2091_s3 }
0x2d08   :  { %1392 = vrot.lane.b32.xlu1 %v2472_v18, %s2090_s22 }
0x2d0c   :  { %1552 = vrot.lane.b32.xlu1 %v1550_v62, %s2092_s15 }
0x2d10   :  { %1630 = vrot.lane.b32.xlu1 %v1628_v22, %s2097_s23 }
0x2d72   :  { %v1702_v40 = vpop.permute.xlu1 %1701 }
0x2d73   :  { %v1704_v55 = vadd.f32 %v1702_v40, %v1694_v39 }
0x2d75   :  { %2061 = vtanh.f32 %v1704_v55 }
0x2d76   :  { %2074 = shalt.err (!%p2071_p4)
}
0x2d77   :  { %s2075_s27 = scalar_lea.hbm %s2575_s9, 64 }
0x2d78   :  { %p2076_p5 = scmp.ne.s32.totalorder %s2575_s9, %s2075_s27  ;;  %p2079_p6 = scmp.lt.u32.totalorder %s2075_s27, %s2575_s9 }
0x2d7a   :  { %p2081_p7 = pnand %p2079_p6, %p2076_p5 }
0x2d7c   :  { %2084 = shalt.err (!%p2081_p7)
}
0x2d7d   :  { %1722 = dma.vmem_to_hbm [thread:$0]  %s1720_s25, 64, %s2575_s9, [#allocation4]   ;;  %v1233_v15 = vpop.permute.xlu1 %1232  ;;  %vm1395_vm14 = vcmask 519552   ;;  %vm1473_vm15 = vcmask 650752   ;;  %v1471_v42 = vpop.permute.xlu0 %1470  ;;  %vm1555_vm0 = vcmask 781952   ;;  %vm1633_vm1 = vcmask 913152  }
0x2d7e   :  { %1236 = vst.msk [vmem:[%s2576_s10] sm:$0xf] %vm1235_vm12, %v1233_v15  ;;  %vm1711_vm2 = vcmask 1044352  }
0x2d7f   :  { %1314 = vst.msk [vmem:[%s2576_s10] sm:$0xf] %vm1313_vm13, %v1311_v41  ;;  %v2062_v44 = vpop.eup %2061 }
0x2d80   :  { %1707 = vrot.lane.b32.xlu0 %v2062_v44, %s2091_s3 }
0x2d81   :  { %v1393_v18 = vpop.permute.xlu1 %1392 }
0x2d82   :  { %1396 = vst.msk [vmem:[%s2576_s10] sm:$0xf] %vm1395_vm14, %v1393_v18 }
0x2d83   :  { %1474 = vst.msk [vmem:[%s2576_s10] sm:$0xf] %vm1473_vm15, %v1471_v42 }
0x2d85   :  { %v1553_v43 = vpop.permute.xlu1 %1552 }
0x2d86   :  { %1556 = vst.msk [vmem:[%s2576_s10] sm:$0xf] %vm1555_vm0, %v1553_v43 }
0x2d89   :  { %v1631_v45 = vpop.permute.xlu1 %1630 }
0x2d8a   :  { %1634 = vst.msk [vmem:[%s2576_s10] sm:$0xf] %vm1633_vm1, %v1631_v45 }
0x2df2   :  { %v1708_v46 = vpop.permute.xlu0 %1707 }
0x2df3   :  { %v1710_v47 = vmul.f32 %v1708_v46, %v1689_v36 }
0x2df5   :  { %1712 = vst.msk [vmem:[%s2576_s10] sm:$0xf] %vm1711_vm2, %v1710_v47 }
0x2df6   :  { %2085 = dma.done.wait [#allocation4], 64  }
0x2df7   :  { %2086 = vsyncadd [#allocation4], 4294967232 }
0x2df8   :  { %1730 = vsyncpa [#allocation4], 1 }

</bundles_post_ra>
